<compile_context>
chip_gen: v6e
topology: v6e:2x2x1
jax: 0.10.0
libtpu: 0.0.40
codegen_flags: <defaults>
</compile_context>

<pallas_src>
import jax
import jax.numpy as jnp
from jax import lax
from jax.experimental import pallas as pl
from jax.experimental.pallas import tpu as pltpu

LATENT = 64
HALF = LATENT // 2            # 32
HID = 128
D_INERTIAL = 201 * 3          # 603
D_LEG = 25 * 36               # 900
D_FEET = 25 * 20              # 500
OUT_PAD = 128                 # lane-dense output width (sliced back to LATENT)


def _cdiv(a, b):
    return -(-a // b)


def _round_up(x, m):
    return ((x + m - 1) // m) * m


def _tensorcores_per_chip():
    # v7x has 2 TensorCores sharing "parallel" grid axes; v5e/v6e have 1
    # (there the grid is a purely serial loop, so splitting adds overhead).
    try:
        kind = jax.devices()[0].device_kind.lower()
    except Exception:
        return 1
    return 2 if ("v7" in kind or "7x" in kind) else 1


def _mish(x):
    # Mish(x) = x * tanh(softplus(x)), with a single transcendental:
    #   tanh(softplus(x)) = 1 - 2 / ((1 + e^x)^2 + 1)
    # Clamp keeps exp finite; for x > 20 the factor is 1.0 to f32 precision.
    ex = jnp.exp(jnp.minimum(x, 20.0))
    ex1 = 1.0 + ex
    return x * (1.0 - 2.0 / (ex1 * ex1 + 1.0))


def ipt_encoder_kernel(
    xi_ref, xl_ref, xf_ref,
    wi1_ref, bi1_ref, wl1_ref, bl1_ref, wf1_ref, bf1_ref,
    wfold_ref, bfold_ref, wc2_ref, bc2_ref,
    out_ref,
):
    cd = wi1_ref.dtype  # matmul compute dtype (bf16 or f32)

    # inputs arrive in their natural dtype; cast on the VPU (cheap, no HBM pass)
    xi = xi_ref[...].astype(cd)
    xl = xl_ref[...].astype(cd)
    xf = xf_ref[...].astype(cd)

    # encoder first layers (+ Mish); Dropout is identity at inference time
    hi = _mish(jnp.dot(xi, wi1_ref[...], preferred_element_type=jnp.float32)
               + bi1_ref[...])
    hl = _mish(jnp.dot(xl, wl1_ref[...], preferred_element_type=jnp.float32)
               + bl1_ref[...])
    hf = _mish(jnp.dot(xf, wf1_ref[...], preferred_element_type=jnp.float32)
               + bf1_ref[...])

    # encoder second Linears folded into fc[0] (no nonlinearity between them),
    # fused into ONE K=384 matmul with in-MXU K accumulation:
    #   cat([hi@wi2, hl@wl2, hf@wf2]) @ wc1 + bc1
    #     == cat([hi,hl,hf]) @ vstack([wi2@wc1_i, wl2@wc1_l, wf2@wc1_f]) + b_fold
    hcat = jnp.concatenate([hi, hl, hf], axis=-1).astype(cd)
    h = _mish(jnp.dot(hcat, wfold_ref[...], preferred_element_type=jnp.float32)
              + bfold_ref[...])

    # last Linear, zero-padded to 128 output columns -> lane-dense store
    y = (jnp.dot(h.astype(cd), wc2_ref[...], preferred_element_type=jnp.float32)
         + bc2_ref[...])

    # F.normalize(dim=-1): columns 64..127 of y are exactly zero, so the sum
    # over all 128 lanes equals the sum over the real 64 latent dims.
    ssq = jnp.sum(y * y, axis=-1, keepdims=True)
    out_ref[...] = y * lax.rsqrt(jnp.maximum(ssq, 1e-24))


def init_params(key):
    """Deterministic synthetic parameters (PyTorch-default-style uniform init)."""
    def linear(k, din, dout):
        kw, kb = jax.random.split(k)
        bound = 1.0 / (din ** 0.5)
        w = jax.random.uniform(kw, (din, dout), jnp.float32, -bound, bound)
        b = jax.random.uniform(kb, (1, dout), jnp.float32, -bound, bound)
        return w, b

    ks = jax.random.split(key, 8)
    wi1, bi1 = linear(ks[0], D_INERTIAL, HID)
    wi2, bi2 = linear(ks[1], HID, HALF)
    wl1, bl1 = linear(ks[2], D_LEG, HID)
    wl2, bl2 = linear(ks[3], HID, HALF)
    wf1, bf1 = linear(ks[4], D_FEET, HID)
    wf2, bf2 = linear(ks[5], HID, HALF)
    wc1, bc1 = linear(ks[6], 3 * HALF, LATENT)
    wc2, bc2 = linear(ks[7], LATENT, LATENT)
    return dict(
        wi1=wi1, bi1=bi1, wi2=wi2, bi2=bi2,
        wl1=wl1, bl1=bl1, wl2=wl2, bl2=bl2,
        wf1=wf1, bf1=bf1, wf2=wf2, bf2=bf2,
        wc1=wc1, bc1=bc1, wc2=wc2, bc2=bc2,
    )


def ipt_encoder_forward(inertial, leg, feet, params, *, block_b=512,
                        compute_dtype=jnp.bfloat16):
    f32 = jnp.float32
    B = inertial.shape[0]

    # ---- batch tiling: equal-sized, multiple-of-8 tiles; padding capped at
    #      <8 rows per tile.  Only split a single-tile batch on 2-TC chips.
    num_tc = _tensorcores_per_chip()
    bb_cap = max(8, min(int(block_b), 1024))   # 1024 keeps double-buffered f32
                                               # input tiles well inside 32 MiB
    n_tiles = _cdiv(B, bb_cap)
    if num_tc > 1 and n_tiles % num_tc != 0 and B >= num_tc * 8:
        n_tiles += num_tc - (n_tiles % num_tc)   # balanced steps across TCs
    bb = _round_up(_cdiv(B, n_tiles), 8)
    Bp = bb * n_tiles
    grid = (n_tiles,)

    def prep(x):
        x = x.reshape(B, -1)
        if Bp != B:
            x = jnp.pad(x, ((0, Bp - B), (0, 0)))
        return x

    x_i = prep(inertial)
    x_l = prep(leg)
    x_f = prep(feet)

    # ---- parameter preprocessing (tiny, one-time, in f32): fold the encoder
    #      output Linears into fc[0], stack into one (384, 64) weight, and
    #      zero-pad the last Linear to 128 output lanes.
    wc1 = params["wc1"].astype(f32)
    wc1_i, wc1_l, wc1_f = wc1[:HALF], wc1[HALF:2 * HALF], wc1[2 * HALF:]
    wfold = jnp.concatenate([
        params["wi2"].astype(f32) @ wc1_i,
        params["wl2"].astype(f32) @ wc1_l,
        params["wf2"].astype(f32) @ wc1_f,
    ], axis=0)                                        # (3*HID, LATENT)
    bfold = (params["bi2"].astype(f32) @ wc1_i
             + params["bl2"].astype(f32) @ wc1_l
             + params["bf2"].astype(f32) @ wc1_f
             + params["bc1"].astype(f32))             # (1, LATENT)
    wc2p = jnp.pad(params["wc2"].astype(f32), ((0, 0), (0, OUT_PAD - LATENT)))
    bc2p = jnp.pad(params["bc2"].astype(f32), ((0, 0), (0, OUT_PAD - LATENT)))

    weights = [
        params["wi1"].astype(compute_dtype), params["bi1"].astype(f32),
        params["wl1"].astype(compute_dtype), params["bl1"].astype(f32),
        params["wf1"].astype(compute_dtype), params["bf1"].astype(f32),
        wfold.astype(compute_dtype), bfold,
        wc2p.astype(compute_dtype), bc2p,
    ]

    in_specs = (
        [pl.BlockSpec((bb, D_INERTIAL), lambda i: (i, 0)),
         pl.BlockSpec((bb, D_LEG), lambda i: (i, 0)),
         pl.BlockSpec((bb, D_FEET), lambda i: (i, 0))]
        + [pl.BlockSpec(w.shape, lambda i: (0, 0)) for w in weights]
    )

    out = pl.pallas_call(
        ipt_encoder_kernel,
        out_shape=jax.ShapeDtypeStruct((Bp, OUT_PAD), jnp.float32),
        grid=grid,
        in_specs=in_specs,
        out_specs=pl.BlockSpec((bb, OUT_PAD), lambda i: (i, 0)),
        compiler_params=pltpu.CompilerParams(
            dimension_semantics=("parallel",),
            vmem_limit_bytes=32 * 1024 * 1024),
    )(x_i, x_l, x_f, *weights)
    return out[:B, :LATENT]


def ipt_encoder_reference(inertial, leg, feet, params):
    """Pure-JAX reference mirroring the PyTorch forward (eval mode), f32."""
    B = inertial.shape[0]

    def mish(x):
        return x * jnp.tanh(jnp.logaddexp(x, 0.0))

    def enc(x, w1, b1, w2, b2):
        h = mish(x @ w1 + b1)
        return h @ w2 + b2

    fi = enc(inertial.reshape(B, -1), params["wi1"], params["bi1"],
             params["wi2"], params["bi2"])
    fl = enc(leg.reshape(B, -1), params["wl1"], params["bl1"],
             params["wl2"], params["bl2"])
    ff = enc(feet.reshape(B, -1), params["wf1"], params["bf1"],
             params["wf2"], params["bf2"])
    comb = jnp.concatenate([fi, fl, ff], axis=1)
    h = mish(comb @ params["wc1"] + params["bc1"])
    y = h @ params["wc2"] + params["bc2"]
    norm = jnp.sqrt(jnp.sum(y * y, axis=-1, keepdims=True))
    return y / jnp.maximum(norm, 1e-12)


if __name__ == "__main__":
    key = jax.random.PRNGKey(0)
    k_p, k_i, k_l, k_f = jax.random.split(key, 4)

    params = init_params(k_p)

    # small batch, deliberately not a multiple of 8 to exercise batch padding
    B = 6
    inertial = jax.random.normal(k_i, (B, 201, 3), jnp.float32)
    leg = jax.random.normal(k_l, (B, 25, 36), jnp.float32)
    feet = jax.random.normal(k_f, (B, 25, 20), jnp.float32)

    ref = ipt_encoder_reference(inertial, leg, feet, params)

    out_f32 = jax.block_until_ready(
        ipt_encoder_forward(inertial, leg, feet, params,
                            compute_dtype=jnp.float32))
    assert out_f32.shape == (B, LATENT)
    assert jnp.allclose(out_f32, ref, atol=1e-4, rtol=1e-4), \
        "f32 kernel mismatch vs reference"

    out_bf16 = jax.block_until_ready(
        ipt_encoder_forward(inertial, leg, feet, params,
                            compute_dtype=jnp.bfloat16))
    assert out_bf16.shape == (B, LATENT)
    assert float(jnp.max(jnp.abs(out_bf16 - ref))) < 3e-2, \
        "bf16 kernel drifted too far from f32 reference"

    # multi-tile path (equal-sized tiles, small block_b to force a >1 grid)
    B2 = 40
    k_i2, k_l2, k_f2 = jax.random.split(jax.random.PRNGKey(1), 3)
    inertial2 = jax.random.normal(k_i2, (B2, 201, 3), jnp.float32)
    leg2 = jax.random.normal(k_l2, (B2, 25, 36), jnp.float32)
    feet2 = jax.random.normal(k_f2, (B2, 25, 20), jnp.float32)
    ref2 = ipt_encoder_reference(inertial2, leg2, feet2, params)
    out2 = jax.block_until_ready(
        ipt_encoder_forward(inertial2, leg2, feet2, params,
                            block_b=16, compute_dtype=jnp.float32))
    assert out2.shape == (B2, LATENT)
    assert jnp.allclose(out2, ref2, atol=1e-4, rtol=1e-4), \
        "multi-tile f32 kernel mismatch vs reference"

    print("KERNEL_OK")
</pallas_src>

<mosaic_0001>
module attributes {stable_mosaic.version = 11 : i64} {
  func.func @ipt_encoder_kernel(%arg0: i32, %arg1: memref<8x603xf32, #tpu.memory_space<vmem>>, %arg2: memref<8x900xf32, #tpu.memory_space<vmem>>, %arg3: memref<8x500xf32, #tpu.memory_space<vmem>>, %arg4: memref<603x128xf32, #tpu.memory_space<vmem>>, %arg5: memref<1x128xf32, #tpu.memory_space<vmem>>, %arg6: memref<900x128xf32, #tpu.memory_space<vmem>>, %arg7: memref<1x128xf32, #tpu.memory_space<vmem>>, %arg8: memref<500x128xf32, #tpu.memory_space<vmem>>, %arg9: memref<1x128xf32, #tpu.memory_space<vmem>>, %arg10: memref<384x64xf32, #tpu.memory_space<vmem>>, %arg11: memref<1x64xf32, #tpu.memory_space<vmem>>, %arg12: memref<64x128xf32, #tpu.memory_space<vmem>>, %arg13: memref<1x128xf32, #tpu.memory_space<vmem>>, %arg14: memref<8x128xf32, #tpu.memory_space<vmem>>) attributes {dimension_semantics = [#tpu.dimension_semantics<parallel>], iteration_bounds = array<i64: 1>, scalar_prefetch = 0 : i64, scratch_operands = 0 : i64, tpu.core_type = #tpu.core_type<tc>, window_params = [{transform_indices = @transform_0, window_bounds = array<i64: 8, 603>}, {transform_indices = @transform_1, window_bounds = array<i64: 8, 900>}, {transform_indices = @transform_2, window_bounds = array<i64: 8, 500>}, {pipeline_mode = #tpu.pipeline_mode<synchronous>, transform_indices = @transform_3, window_bounds = array<i64: 603, 128>}, {pipeline_mode = #tpu.pipeline_mode<synchronous>, transform_indices = @transform_4, window_bounds = array<i64: 1, 128>}, {pipeline_mode = #tpu.pipeline_mode<synchronous>, transform_indices = @transform_5, window_bounds = array<i64: 900, 128>}, {pipeline_mode = #tpu.pipeline_mode<synchronous>, transform_indices = @transform_6, window_bounds = array<i64: 1, 128>}, {pipeline_mode = #tpu.pipeline_mode<synchronous>, transform_indices = @transform_7, window_bounds = array<i64: 500, 128>}, {pipeline_mode = #tpu.pipeline_mode<synchronous>, transform_indices = @transform_8, window_bounds = array<i64: 1, 128>}, {pipeline_mode = #tpu.pipeline_mode<synchronous>, transform_indices = @transform_9, window_bounds = array<i64: 384, 64>}, {pipeline_mode = #tpu.pipeline_mode<synchronous>, transform_indices = @transform_10, window_bounds = array<i64: 1, 64>}, {pipeline_mode = #tpu.pipeline_mode<synchronous>, transform_indices = @transform_11, window_bounds = array<i64: 64, 128>}, {pipeline_mode = #tpu.pipeline_mode<synchronous>, transform_indices = @transform_12, window_bounds = array<i64: 1, 128>}, {transform_indices = @transform_13, window_bounds = array<i64: 8, 128>}]} {
    %c0 = arith.constant 0 : index
    %c0_0 = arith.constant 0 : index
    %0 = vector.load %arg1[%c0, %c0_0] : memref<8x603xf32, #tpu.memory_space<vmem>>, vector<8x603xf32>
    %c0_1 = arith.constant 0 : index
    %c0_2 = arith.constant 0 : index
    %1 = vector.load %arg2[%c0_1, %c0_2] : memref<8x900xf32, #tpu.memory_space<vmem>>, vector<8x900xf32>
    %c0_3 = arith.constant 0 : index
    %c0_4 = arith.constant 0 : index
    %2 = vector.load %arg3[%c0_3, %c0_4] : memref<8x500xf32, #tpu.memory_space<vmem>>, vector<8x500xf32>
    %c0_5 = arith.constant 0 : index
    %c0_6 = arith.constant 0 : index
    %3 = vector.load %arg4[%c0_5, %c0_6] : memref<603x128xf32, #tpu.memory_space<vmem>>, vector<603x128xf32>
    %cst = arith.constant dense<0.000000e+00> : vector<8x128xf32>
    %4 = tpu.matmul %0, %3, %cst {dimension_numbers = #tpu.dot_dimension_numbers<[1], [0], [0], [1], [0, 0, 1, 1], [], []>} : vector<8x603xf32>, vector<603x128xf32>, vector<8x128xf32> -> vector<8x128xf32>
    %c0_7 = arith.constant 0 : index
    %c0_8 = arith.constant 0 : index
    %5 = vector.load %arg5[%c0_7, %c0_8] : memref<1x128xf32, #tpu.memory_space<vmem>>, vector<1x128xf32>
    %6 = vector.broadcast %5 : vector<1x128xf32> to vector<8x128xf32>
    %7 = arith.addf %4, %6 : vector<8x128xf32>
    %cst_9 = arith.constant 2.000000e+01 : f32
    %8 = vector.broadcast %cst_9 : f32 to vector<8x128xf32>
    %9 = arith.minimumf %7, %8 : vector<8x128xf32>
    %10 = math.exp %9 : vector<8x128xf32>
    %cst_10 = arith.constant 1.000000e+00 : f32
    %11 = vector.broadcast %cst_10 : f32 to vector<8x128xf32>
    %12 = arith.addf %11, %10 : vector<8x128xf32>
    %13 = arith.mulf %12, %12 : vector<8x128xf32>
    %cst_11 = arith.constant 1.000000e+00 : f32
    %14 = vector.broadcast %cst_11 : f32 to vector<8x128xf32>
    %15 = arith.addf %13, %14 : vector<8x128xf32>
    %cst_12 = arith.constant 2.000000e+00 : f32
    %16 = vector.broadcast %cst_12 : f32 to vector<8x128xf32>
    %17 = arith.divf %16, %15 : vector<8x128xf32>
    %cst_13 = arith.constant 1.000000e+00 : f32
    %18 = vector.broadcast %cst_13 : f32 to vector<8x128xf32>
    %19 = arith.subf %18, %17 : vector<8x128xf32>
    %20 = arith.mulf %7, %19 : vector<8x128xf32>
    %c0_14 = arith.constant 0 : index
    %c0_15 = arith.constant 0 : index
    %21 = vector.load %arg6[%c0_14, %c0_15] : memref<900x128xf32, #tpu.memory_space<vmem>>, vector<900x128xf32>
    %cst_16 = arith.constant dense<0.000000e+00> : vector<8x128xf32>
    %22 = tpu.matmul %1, %21, %cst_16 {dimension_numbers = #tpu.dot_dimension_numbers<[1], [0], [0], [1], [0, 0, 1, 1], [], []>} : vector<8x900xf32>, vector<900x128xf32>, vector<8x128xf32> -> vector<8x128xf32>
    %c0_17 = arith.constant 0 : index
    %c0_18 = arith.constant 0 : index
    %23 = vector.load %arg7[%c0_17, %c0_18] : memref<1x128xf32, #tpu.memory_space<vmem>>, vector<1x128xf32>
    %24 = vector.broadcast %23 : vector<1x128xf32> to vector<8x128xf32>
    %25 = arith.addf %22, %24 : vector<8x128xf32>
    %cst_19 = arith.constant 2.000000e+01 : f32
    %26 = vector.broadcast %cst_19 : f32 to vector<8x128xf32>
    %27 = arith.minimumf %25, %26 : vector<8x128xf32>
    %28 = math.exp %27 : vector<8x128xf32>
    %cst_20 = arith.constant 1.000000e+00 : f32
    %29 = vector.broadcast %cst_20 : f32 to vector<8x128xf32>
    %30 = arith.addf %29, %28 : vector<8x128xf32>
    %31 = arith.mulf %30, %30 : vector<8x128xf32>
    %cst_21 = arith.constant 1.000000e+00 : f32
    %32 = vector.broadcast %cst_21 : f32 to vector<8x128xf32>
    %33 = arith.addf %31, %32 : vector<8x128xf32>
    %cst_22 = arith.constant 2.000000e+00 : f32
    %34 = vector.broadcast %cst_22 : f32 to vector<8x128xf32>
    %35 = arith.divf %34, %33 : vector<8x128xf32>
    %cst_23 = arith.constant 1.000000e+00 : f32
    %36 = vector.broadcast %cst_23 : f32 to vector<8x128xf32>
    %37 = arith.subf %36, %35 : vector<8x128xf32>
    %38 = arith.mulf %25, %37 : vector<8x128xf32>
    %c0_24 = arith.constant 0 : index
    %c0_25 = arith.constant 0 : index
    %39 = vector.load %arg8[%c0_24, %c0_25] : memref<500x128xf32, #tpu.memory_space<vmem>>, vector<500x128xf32>
    %cst_26 = arith.constant dense<0.000000e+00> : vector<8x128xf32>
    %40 = tpu.matmul %2, %39, %cst_26 {dimension_numbers = #tpu.dot_dimension_numbers<[1], [0], [0], [1], [0, 0, 1, 1], [], []>} : vector<8x500xf32>, vector<500x128xf32>, vector<8x128xf32> -> vector<8x128xf32>
    %c0_27 = arith.constant 0 : index
    %c0_28 = arith.constant 0 : index
    %41 = vector.load %arg9[%c0_27, %c0_28] : memref<1x128xf32, #tpu.memory_space<vmem>>, vector<1x128xf32>
    %42 = vector.broadcast %41 : vector<1x128xf32> to vector<8x128xf32>
    %43 = arith.addf %40, %42 : vector<8x128xf32>
    %cst_29 = arith.constant 2.000000e+01 : f32
    %44 = vector.broadcast %cst_29 : f32 to vector<8x128xf32>
    %45 = arith.minimumf %43, %44 : vector<8x128xf32>
    %46 = math.exp %45 : vector<8x128xf32>
    %cst_30 = arith.constant 1.000000e+00 : f32
    %47 = vector.broadcast %cst_30 : f32 to vector<8x128xf32>
    %48 = arith.addf %47, %46 : vector<8x128xf32>
    %49 = arith.mulf %48, %48 : vector<8x128xf32>
    %cst_31 = arith.constant 1.000000e+00 : f32
    %50 = vector.broadcast %cst_31 : f32 to vector<8x128xf32>
    %51 = arith.addf %49, %50 : vector<8x128xf32>
    %cst_32 = arith.constant 2.000000e+00 : f32
    %52 = vector.broadcast %cst_32 : f32 to vector<8x128xf32>
    %53 = arith.divf %52, %51 : vector<8x128xf32>
    %cst_33 = arith.constant 1.000000e+00 : f32
    %54 = vector.broadcast %cst_33 : f32 to vector<8x128xf32>
    %55 = arith.subf %54, %53 : vector<8x128xf32>
    %56 = arith.mulf %43, %55 : vector<8x128xf32>
    %57 = tpu.concatenate %20, %38, %56 in 1 : vector<8x128xf32>, vector<8x128xf32>, vector<8x128xf32> -> vector<8x384xf32>
    %c0_34 = arith.constant 0 : index
    %c0_35 = arith.constant 0 : index
    %58 = vector.load %arg10[%c0_34, %c0_35] : memref<384x64xf32, #tpu.memory_space<vmem>>, vector<384x64xf32>
    %cst_36 = arith.constant dense<0.000000e+00> : vector<8x64xf32>
    %59 = tpu.matmul %57, %58, %cst_36 {dimension_numbers = #tpu.dot_dimension_numbers<[1], [0], [0], [1], [0, 0, 1, 1], [], []>} : vector<8x384xf32>, vector<384x64xf32>, vector<8x64xf32> -> vector<8x64xf32>
    %c0_37 = arith.constant 0 : index
    %c0_38 = arith.constant 0 : index
    %60 = vector.load %arg11[%c0_37, %c0_38] : memref<1x64xf32, #tpu.memory_space<vmem>>, vector<1x64xf32>
    %61 = vector.broadcast %60 : vector<1x64xf32> to vector<8x64xf32>
    %62 = arith.addf %59, %61 : vector<8x64xf32>
    %cst_39 = arith.constant 2.000000e+01 : f32
    %63 = vector.broadcast %cst_39 : f32 to vector<8x64xf32>
    %64 = arith.minimumf %62, %63 : vector<8x64xf32>
    %65 = math.exp %64 : vector<8x64xf32>
    %cst_40 = arith.constant 1.000000e+00 : f32
    %66 = vector.broadcast %cst_40 : f32 to vector<8x64xf32>
    %67 = arith.addf %66, %65 : vector<8x64xf32>
    %68 = arith.mulf %67, %67 : vector<8x64xf32>
    %cst_41 = arith.constant 1.000000e+00 : f32
    %69 = vector.broadcast %cst_41 : f32 to vector<8x64xf32>
    %70 = arith.addf %68, %69 : vector<8x64xf32>
    %cst_42 = arith.constant 2.000000e+00 : f32
    %71 = vector.broadcast %cst_42 : f32 to vector<8x64xf32>
    %72 = arith.divf %71, %70 : vector<8x64xf32>
    %cst_43 = arith.constant 1.000000e+00 : f32
    %73 = vector.broadcast %cst_43 : f32 to vector<8x64xf32>
    %74 = arith.subf %73, %72 : vector<8x64xf32>
    %75 = arith.mulf %62, %74 : vector<8x64xf32>
    %c0_44 = arith.constant 0 : index
    %c0_45 = arith.constant 0 : index
    %76 = vector.load %arg12[%c0_44, %c0_45] : memref<64x128xf32, #tpu.memory_space<vmem>>, vector<64x128xf32>
    %cst_46 = arith.constant dense<0.000000e+00> : vector<8x128xf32>
    %77 = tpu.matmul %75, %76, %cst_46 {dimension_numbers = #tpu.dot_dimension_numbers<[1], [0], [0], [1], [0, 0, 1, 1], [], []>} : vector<8x64xf32>, vector<64x128xf32>, vector<8x128xf32> -> vector<8x128xf32>
    %c0_47 = arith.constant 0 : index
    %c0_48 = arith.constant 0 : index
    %78 = vector.load %arg13[%c0_47, %c0_48] : memref<1x128xf32, #tpu.memory_space<vmem>>, vector<1x128xf32>
    %79 = vector.broadcast %78 : vector<1x128xf32> to vector<8x128xf32>
    %80 = arith.addf %77, %79 : vector<8x128xf32>
    %81 = arith.mulf %80, %80 : vector<8x128xf32>
    %cst_49 = arith.constant dense<0.000000e+00> : vector<8xf32>
    %82 = vector.multi_reduction <add>, %81, %cst_49 [1] : vector<8x128xf32> to vector<8xf32>
    %83 = vector.shape_cast %82 : vector<8xf32> to vector<8x1xf32>
    %cst_50 = arith.constant 1.000000e-24 : f32
    %84 = vector.broadcast %cst_50 : f32 to vector<8x1xf32>
    %85 = arith.maximumf %83, %84 : vector<8x1xf32>
    %86 = math.rsqrt %85 : vector<8x1xf32>
    %87 = vector.broadcast %86 : vector<8x1xf32> to vector<8x128xf32>
    %88 = arith.mulf %80, %87 : vector<8x128xf32>
    %c0_51 = arith.constant 0 : index
    %c0_52 = arith.constant 0 : index
    %89 = vector.load %arg14[%c0_51, %c0_52] : memref<8x128xf32, #tpu.memory_space<vmem>>, vector<8x128xf32>
    tpu.vector_store %arg14[%c0_51, %c0_52], %88 {strides = array<i32>} : memref<8x128xf32, #tpu.memory_space<vmem>>, vector<8x128xf32>,
    return
  }
  func.func @transform_0(%arg0: i32) -> (i32, i32) {
    %c0_i32 = arith.constant 0 : i32
    %c0_i32_0 = arith.constant 0 : i32
    return %arg0, %c0_i32 : i32, i32
  }
  func.func @transform_1(%arg0: i32) -> (i32, i32) {
    %c0_i32 = arith.constant 0 : i32
    %c0_i32_0 = arith.constant 0 : i32
    return %arg0, %c0_i32 : i32, i32
  }
  func.func @transform_2(%arg0: i32) -> (i32, i32) {
    %c0_i32 = arith.constant 0 : i32
    %c0_i32_0 = arith.constant 0 : i32
    return %arg0, %c0_i32 : i32, i32
  }
  func.func @transform_3(%arg0: i32) -> (i32, i32) {
    %c0_i32 = arith.constant 0 : i32
    %c0_i32_0 = arith.constant 0 : i32
    %c0_i32_1 = arith.constant 0 : i32
    return %c0_i32, %c0_i32_0 : i32, i32
  }
  func.func @transform_4(%arg0: i32) -> (i32, i32) {
    %c0_i32 = arith.constant 0 : i32
    %c0_i32_0 = arith.constant 0 : i32
    %c0_i32_1 = arith.constant 0 : i32
    return %c0_i32, %c0_i32_0 : i32, i32
  }
  func.func @transform_5(%arg0: i32) -> (i32, i32) {
    %c0_i32 = arith.constant 0 : i32
    %c0_i32_0 = arith.constant 0 : i32
    %c0_i32_1 = arith.constant 0 : i32
    return %c0_i32, %c0_i32_0 : i32, i32
  }
  func.func @transform_6(%arg0: i32) -> (i32, i32) {
    %c0_i32 = arith.constant 0 : i32
    %c0_i32_0 = arith.constant 0 : i32
    %c0_i32_1 = arith.constant 0 : i32
    return %c0_i32, %c0_i32_0 : i32, i32
  }
  func.func @transform_7(%arg0: i32) -> (i32, i32) {
    %c0_i32 = arith.constant 0 : i32
    %c0_i32_0 = arith.constant 0 : i32
    %c0_i32_1 = arith.constant 0 : i32
    return %c0_i32, %c0_i32_0 : i32, i32
  }
  func.func @transform_8(%arg0: i32) -> (i32, i32) {
    %c0_i32 = arith.constant 0 : i32
    %c0_i32_0 = arith.constant 0 : i32
    %c0_i32_1 = arith.constant 0 : i32
    return %c0_i32, %c0_i32_0 : i32, i32
  }
  func.func @transform_9(%arg0: i32) -> (i32, i32) {
    %c0_i32 = arith.constant 0 : i32
    %c0_i32_0 = arith.constant 0 : i32
    %c0_i32_1 = arith.constant 0 : i32
    return %c0_i32, %c0_i32_0 : i32, i32
  }
  func.func @transform_10(%arg0: i32) -> (i32, i32) {
    %c0_i32 = arith.constant 0 : i32
    %c0_i32_0 = arith.constant 0 : i32
    %c0_i32_1 = arith.constant 0 : i32
    return %c0_i32, %c0_i32_0 : i32, i32
  }
  func.func @transform_11(%arg0: i32) -> (i32, i32) {
    %c0_i32 = arith.constant 0 : i32
    %c0_i32_0 = arith.constant 0 : i32
    %c0_i32_1 = arith.constant 0 : i32
    return %c0_i32, %c0_i32_0 : i32, i32
  }
  func.func @transform_12(%arg0: i32) -> (i32, i32) {
    %c0_i32 = arith.constant 0 : i32
    %c0_i32_0 = arith.constant 0 : i32
    %c0_i32_1 = arith.constant 0 : i32
    return %c0_i32, %c0_i32_0 : i32, i32
  }
  func.func @transform_13(%arg0: i32) -> (i32, i32) {
    %c0_i32 = arith.constant 0 : i32
    %c0_i32_0 = arith.constant 0 : i32
    return %arg0, %c0_i32 : i32, i32
  }
}

</mosaic_0001>

<bundles_post_ra>
// kernel: tpu_custom_call.1
= control target key start
LH: loop header
LB: loop body
LE: loop exit
PB: predicated region body
PF: predicated region fallthrough
CT: control target
= control target key end

     0   :  { %18 = vsyncpa [#allocation3], 0  ;;  %s2504_s0 = inlined_call_operand.hbm [shape: f32[8,603], index: 0, kind: input, shape index: {}]   ;;  %s2505_s1 = inlined_call_operand.vmem [shape: f32[8,900], index: 1, kind: input, shape index: {}]   ;;  %s2506_s2 = inlined_call_operand.hbm [shape: f32[8,500], index: 2, kind: input, shape index: {}]   ;;  %s2507_s3 = inlined_call_operand.hbm [shape: f32[603,128], index: 3, kind: input, shape index: {}]   ;;  %s2508_s4 = inlined_call_operand.vmem [shape: f32[1,128], index: 4, kind: input, shape index: {}]   ;;  %s2509_s5 = inlined_call_operand.hbm [shape: f32[900,128], index: 5, kind: input, shape index: {}]   ;;  %s2510_s6 = inlined_call_operand.vmem [shape: f32[1,128], index: 6, kind: input, shape index: {}]   ;;  %s2511_s7 = inlined_call_operand.vmem [shape: f32[500,128], index: 7, kind: input, shape index: {}]   ;;  %s2512_s8 = inlined_call_operand.vmem [shape: f32[1,128], index: 8, kind: input, shape index: {}]   ;;  %s2513_s9 = inlined_call_operand.vmem [shape: f32[384,64], index: 9, kind: input, shape index: {}]   ;;  %s2514_s10 = inlined_call_operand.vmem [shape: f32[1,64], index: 10, kind: input, shape index: {}]   ;;  %s2515_s11 = inlined_call_operand.hbm [shape: f32[64,128], index: 11, kind: input, shape index: {}]   ;;  %s2516_s12 = inlined_call_operand.vmem [shape: f32[1,128], index: 12, kind: input, shape index: {}]   ;;  %s2517_s13 = inlined_call_operand.hbm [shape: f32[8,128], index: 13, kind: output, shape index: {}]  }
   0x1   :  { %19 = vsyncpa [#allocation6], 0 }
   0x2   :  { %20 = vsyncpa [#allocation9], 0 }
   0x3   :  { %21 = vsyncpa [#allocation4], 0  ;;  %s1933_s25 = smov [#allocation5]  }
   0x4   :  { %s40_s26 = sshll.u32 %s1933_s25, 4  ;;  %s41_s26 = int_to_ptr.vmem [resolvable:$true] %s40_s26 }
   0x5   :  { %s1813_s27 = scalar_lea.vmem %s41_s26, 512  ;;  %p1818_p1 = scmp.lt.s32.totalorder %s41_s26, %s41_s26 }
   0x6   :  { %p1814_p0 = scmp.ne.s32.totalorder %s41_s26, %s1813_s27  ;;  %p1819_p2 = scmp.lt.s32.totalorder %s1813_s27, %s1813_s27 }
   0x8   :  { %p1820_p3 = por %p1819_p2, %p1818_p1 }
   0xa   :  { %p1821_p4 = pnand %p1820_p3, %p1814_p0 }
   0xc   :  { %1824 = shalt.err (!%p1821_p4)
}
   0xd   :  { %43 = dma.hbm_to_vmem [thread:$0]  %s2506_s2, 512, %s41_s26, [#allocation6]  }
   0xe   :  { %s1934_s30 = smov [#allocation8]   ;;  %s1935_s15 = smov [#allocation2]  }
   0xf   :  { %s63_s14 = sshll.u32 %s1934_s30, 4  ;;  %s28_s16 = sshll.u32 %s1935_s15, 4  ;;  %s64_s14 = int_to_ptr.vmem [resolvable:$true] %s63_s14  ;;  %s29_s16 = int_to_ptr.vmem [resolvable:$true] %s28_s16 }
  0x10   :  { %s1833_s17 = scalar_lea.vmem %s64_s14, 14464  ;;  %p1838_p6 = scmp.lt.s32.totalorder %s64_s14, %s64_s14 }
  0x11   :  { %p1834_p5 = scmp.ne.s32.totalorder %s64_s14, %s1833_s17  ;;  %p1839_p7 = scmp.lt.s32.totalorder %s1833_s17, %s1833_s17 }
  0x13   :  { %p1840_p8 = por %p1839_p7, %p1838_p6 }
  0x15   :  { %p1841_p9 = pnand %p1840_p8, %p1834_p5 }
  0x17   :  { %1844 = shalt.err (!%p1841_p9)
}
  0x18   :  { %s1936_s18 = smov 128   ;;  %s1937_s19 = smov 8  }
  0x19   :  { %69 = dma.hbm_to_vmem [thread:$0]  %s2509_s5, 14464, %s64_s14, [#allocation9], %s1936_s18, %s1936_s18, %s1937_s19  }
  0x1a   :  { %s1853_s2 = scalar_lea.vmem %s29_s16, 640  ;;  %p1858_p11 = scmp.lt.s32.totalorder %s29_s16, %s29_s16 }
  0x1b   :  { %p1854_p10 = scmp.ne.s32.totalorder %s29_s16, %s1853_s2  ;;  %p1859_p12 = scmp.lt.s32.totalorder %s1853_s2, %s1853_s2 }
  0x1d   :  { %p1860_p13 = por %p1859_p12, %p1858_p11 }
  0x1f   :  { %p1861_p0 = pnand %p1860_p13, %p1854_p10 }
  0x21   :  { %1864 = shalt.err (!%p1861_p0)
}
  0x22   :  { %31 = dma.hbm_to_vmem [thread:$0]  %s2504_s0, 640, %s29_s16, [#allocation3]  }
  0x23   :  { %s1938_s24 = smov [#allocation7]   ;;  %s1939_s26 = smov [#allocation10]  }
  0x24   :  { %s49_s25 = sshll.u32 %s1938_s24, 4  ;;  %s85_s27 = sshll.u32 %s1939_s26, 4  ;;  %s50_s25 = int_to_ptr.vmem [resolvable:$true] %s49_s25  ;;  %s86_s27 = int_to_ptr.vmem [resolvable:$true] %s85_s27 }
  0x25   :  { %s1873_s28 = scalar_lea.vmem %s50_s25, 9728  ;;  %p1878_p2 = scmp.lt.s32.totalorder %s50_s25, %s50_s25 }
  0x26   :  { %p1874_p1 = scmp.ne.s32.totalorder %s50_s25, %s1873_s28  ;;  %p1879_p3 = scmp.lt.s32.totalorder %s1873_s28, %s1873_s28 }
  0x28   :  { %p1880_p4 = por %p1879_p3, %p1878_p2 }
  0x2a   :  { %p1881_p5 = pnand %p1880_p4, %p1874_p1 }
  0x2c   :  { %1884 = shalt.err (!%p1881_p5)
}
  0x2d   :  { %55 = dma.hbm_to_vmem [thread:$0]  %s2507_s3, 9728, %s50_s25, [#allocation6], %s1936_s18, %s1936_s18, %s1937_s19  }
  0x2e   :  { %s1893_s0 = scalar_lea.vmem %s86_s27, 1024  ;;  %p1898_p7 = scmp.lt.s32.totalorder %s86_s27, %s86_s27 }
  0x2f   :  { %p1894_p6 = scmp.ne.s32.totalorder %s86_s27, %s1893_s0  ;;  %p1899_p8 = scmp.lt.s32.totalorder %s1893_s0, %s1893_s0 }
  0x31   :  { %p1900_p9 = por %p1899_p8, %p1898_p7 }
  0x33   :  { %p1901_p10 = pnand %p1900_p9, %p1894_p6 }
  0x35   :  { %1904 = shalt.err (!%p1901_p10)
}
  0x36   :  { %91 = dma.hbm_to_vmem [thread:$0]  %s2515_s11, 1024, %s86_s27, [#allocation9], %s1936_s18, %s1936_s18, %s1937_s19  }
  0x37   :  { %1925 = dma.done.wait [#allocation3], 640  }
  0x38   :  { %1926 = vsyncadd [#allocation3], 4294966656 }
  0x39   :  { %1927 = dma.done.wait [#allocation6], 10240  }
  0x3a   :  { %1928 = vsyncadd [#allocation6], 4294957056 }
  0x3b   :  { %1929 = dma.done.wait [#allocation9], 15488  }
  0x3c   :  { %1930 = vsyncadd [#allocation9], 4294951808  ;;  %v157_v0 = vld [vmem:[#allocation7 + $0xf8] sm:$0xff]  ;;  %v156_v4 = vld [vmem:[#allocation7 + $0xf0] sm:$0xff]  ;;  %vm213_vm0 = vcmask 1042432   ;;  %vm209_vm1 = vcmask 744448  }
  0x3d   :  { %v189_v1 = vld [vmem:[#allocation7 + $0x1f8] sm:$0xff]  ;;  %1412 = vmatprep.subr.mxu0 %v157_v0  ;;  %v188_v5 = vld [vmem:[#allocation7 + $0x1f0] sm:$0xff]  ;;  %v155_v8 = vld [vmem:[#allocation7 + $0xe8] sm:$0xff]  ;;  %vm1941_vm2 = vmmov 0   ;;  %vm557_vm3 = vcmask 31744   ;;  %vm561_vm4 = vcmask 1043456  }
  0x3e   :  { %v141_v2 = vld [vmem:[#allocation7 + $0x78] sm:$0xff]  ;;  %1447 = vmatprep.subr.mxu1 %v189_v1  ;;  %v140_v6 = vld [vmem:[#allocation7 + $0x70] sm:$0xff]  ;;  %v187_v9 = vld [vmem:[#allocation7 + $0x1e8] sm:$0xff]  ;;  %vm925_vm5 = vcmask 949248   ;;  %vm1302_vm6 = vcmask 523264   ;;  %s1942_s2 = smov [#allocation11]  }
  0x3f   :  { %v173_v3 = vld [vmem:[#allocation7 + $0x178] sm:$0xff]  ;;  %1413 = vmatpush3.msra.mxu0 %v141_v2  ;;  %v172_v7 = vld [vmem:[#allocation7 + $0x170] sm:$0xff]  ;;  %v139_v10 = vld [vmem:[#allocation7 + $0x68] sm:$0xff] }
  0x40   :  { %1448 = vmatpush3.msra.mxu1 %v173_v3  ;;  %1414 = vmatprep.subr.mxu0 %v156_v4  ;;  %v171_v11 = vld [vmem:[#allocation7 + $0x168] sm:$0xff]  ;;  %v154_v12 = vld [vmem:[#allocation7 + $0xe0] sm:$0xff]  ;;  %v153_v16 = vld [vmem:[#allocation7 + $0xd8] sm:$0xff] }
  0x41   :  { %1449 = vmatprep.subr.mxu1 %v188_v5  ;;  %1415 = vmatpush3.msra.mxu0 %v140_v6  ;;  %v186_v13 = vld [vmem:[#allocation7 + $0x1e0] sm:$0xff]  ;;  %v185_v17 = vld [vmem:[#allocation7 + $0x1d8] sm:$0xff]  ;;  %v152_v20 = vld [vmem:[#allocation7 + $0xd0] sm:$0xff] }
  0x42   :  { %1450 = vmatpush3.msra.mxu1 %v172_v7  ;;  %1416 = vmatprep.subr.mxu0 %v155_v8  ;;  %v138_v14 = vld [vmem:[#allocation7 + $0x60] sm:$0xff]  ;;  %v137_v18 = vld [vmem:[#allocation7 + $0x58] sm:$0xff]  ;;  %v184_v21 = vld [vmem:[#allocation7 + $0x1d0] sm:$0xff]  ;;  %v1940_v7 = vmov 0.0  }
  0x43   :  { %1451 = vmatprep.subr.mxu1 %v187_v9  ;;  %v170_v15 = vld [vmem:[#allocation7 + $0x160] sm:$0xff]  ;;  %1417 = vmatpush3.msra.mxu0 %v139_v10  ;;  %v169_v19 = vld [vmem:[#allocation7 + $0x158] sm:$0xff]  ;;  %v136_v22 = vld [vmem:[#allocation7 + $0x50] sm:$0xff] }
  0x44   :  { %1452 = vmatpush3.msra.mxu1 %v171_v11  ;;  %1418 = vmatprep.subr.mxu0 %v154_v12  ;;  %v168_v23 = vld [vmem:[#allocation7 + $0x150] sm:$0xff]  ;;  %v151_v24 = vld [vmem:[#allocation7 + $0xc8] sm:$0xff]  ;;  %v150_v28 = vld [vmem:[#allocation7 + $0xc0] sm:$0xff] }
  0x45   :  { %1453 = vmatprep.subr.mxu1 %v186_v13  ;;  %1419 = vmatpush3.msra.mxu0 %v138_v14  ;;  %v183_v25 = vld [vmem:[#allocation7 + $0x1c8] sm:$0xff]  ;;  %v182_v29 = vld [vmem:[#allocation7 + $0x1c0] sm:$0xff]  ;;  %v149_v32 = vld [vmem:[#allocation7 + $0xb8] sm:$0xff] }
  0x46   :  { %1454 = vmatpush3.msra.mxu1 %v170_v15  ;;  %1420 = vmatprep.subr.mxu0 %v153_v16  ;;  %v135_v26 = vld [vmem:[#allocation7 + $0x48] sm:$0xff]  ;;  %v134_v30 = vld [vmem:[#allocation7 + $0x40] sm:$0xff]  ;;  %v181_v33 = vld [vmem:[#allocation7 + $0x1b8] sm:$0xff] }
  0x47   :  { %1455 = vmatprep.subr.mxu1 %v185_v17  ;;  %1421 = vmatpush3.msra.mxu0 %v137_v18  ;;  %v167_v27 = vld [vmem:[#allocation7 + $0x148] sm:$0xff]  ;;  %v166_v31 = vld [vmem:[#allocation7 + $0x140] sm:$0xff]  ;;  %v133_v34 = vld [vmem:[#allocation7 + $0x38] sm:$0xff] }
  0x48   :  { %1456 = vmatpush3.msra.mxu1 %v169_v19  ;;  %1422 = vmatprep.subr.mxu0 %v152_v20  ;;  %v165_v35 = vld [vmem:[#allocation7 + $0x138] sm:$0xff]  ;;  %v148_v36 = vld [vmem:[#allocation7 + $0xb0] sm:$0xff]  ;;  %v147_v40 = vld [vmem:[#allocation7 + $0xa8] sm:$0xff] }
  0x49   :  { %1457 = vmatprep.subr.mxu1 %v184_v21  ;;  %1423 = vmatpush3.msra.mxu0 %v136_v22  ;;  %v180_v37 = vld [vmem:[#allocation7 + $0x1b0] sm:$0xff]  ;;  %v179_v41 = vld [vmem:[#allocation7 + $0x1a8] sm:$0xff]  ;;  %v146_v44 = vld [vmem:[#allocation7 + $0xa0] sm:$0xff] }
  0x4a   :  { %1458 = vmatpush3.msra.mxu1 %v168_v23  ;;  %1424 = vmatprep.subr.mxu0 %v151_v24  ;;  %v132_v38 = vld [vmem:[#allocation7 + $0x30] sm:$0xff]  ;;  %v131_v42 = vld [vmem:[#allocation7 + $0x28] sm:$0xff]  ;;  %v178_v45 = vld [vmem:[#allocation7 + $0x1a0] sm:$0xff] }
  0x4b   :  { %1459 = vmatprep.subr.mxu1 %v183_v25  ;;  %1425 = vmatpush3.msra.mxu0 %v135_v26  ;;  %v164_v39 = vld [vmem:[#allocation7 + $0x130] sm:$0xff]  ;;  %v163_v43 = vld [vmem:[#allocation7 + $0x128] sm:$0xff]  ;;  %v130_v46 = vld [vmem:[#allocation7 + $0x20] sm:$0xff] }
  0x4c   :  { %1460 = vmatpush3.msra.mxu1 %v167_v27  ;;  %1426 = vmatprep.subr.mxu0 %v150_v28  ;;  %v162_v47 = vld [vmem:[#allocation7 + $0x120] sm:$0xff]  ;;  %v145_v48 = vld [vmem:[#allocation7 + $0x98] sm:$0xff]  ;;  %v144_v52 = vld [vmem:[#allocation7 + $0x90] sm:$0xff] }
  0x4d   :  { %1461 = vmatprep.subr.mxu1 %v182_v29  ;;  %1427 = vmatpush3.msra.mxu0 %v134_v30  ;;  %v177_v49 = vld [vmem:[#allocation7 + $0x198] sm:$0xff]  ;;  %v176_v53 = vld [vmem:[#allocation7 + $0x190] sm:$0xff]  ;;  %v143_v56 = vld [vmem:[#allocation7 + $0x88] sm:$0xff] }
  0x4e   :  { %1462 = vmatpush3.msra.mxu1 %v166_v31  ;;  %1428 = vmatprep.subr.mxu0 %v149_v32  ;;  %v129_v50 = vld [vmem:[#allocation7 + $0x18] sm:$0xff]  ;;  %v128_v54 = vld [vmem:[#allocation7 + $0x10] sm:$0xff]  ;;  %v175_v57 = vld [vmem:[#allocation7 + $0x188] sm:$0xff] }
  0x4f   :  { %1463 = vmatprep.subr.mxu1 %v181_v33  ;;  %1429 = vmatpush3.msra.mxu0 %v133_v34  ;;  %v161_v51 = vld [vmem:[#allocation7 + $0x118] sm:$0xff]  ;;  %v160_v55 = vld [vmem:[#allocation7 + $0x110] sm:$0xff]  ;;  %v127_v58 = vld [vmem:[#allocation7 + $0x8] sm:$0xff] }
  0x50   :  { %1464 = vmatpush3.msra.mxu1 %v165_v35  ;;  %1430 = vmatprep.subr.mxu0 %v148_v36  ;;  %v159_v59 = vld [vmem:[#allocation7 + $0x108] sm:$0xff]  ;;  %v142_v60 = vld [vmem:[#allocation7 + $0x80] sm:$0xff]  ;;  %v109_v1 = vld [vmem:[#allocation2] sm:$0xff] }
  0x51   :  { %1465 = vmatprep.subr.mxu1 %v180_v37  ;;  %1431 = vmatpush3.msra.mxu0 %v132_v38  ;;  %v174_v61 = vld [vmem:[#allocation7 + $0x180] sm:$0xff]  ;;  %v112_v2 = vld [vmem:[#allocation2 + $0x18] sm:$0xff]  ;;  %v468_v3 = vld [vmem:[#allocation8 + $0xf8] sm:$0xff] }
  0x52   :  { %1466 = vmatpush3.msra.mxu1 %v164_v39  ;;  %1432 = vmatprep.subr.mxu0 %v147_v40  ;;  %v126_v62 = vld [vmem:[#allocation7] sm:$0xff]  ;;  %v111_v4 = vld [vmem:[#allocation2 + $0x10] sm:$0xff]  ;;  %v201_v5 = vld [vmem:[#allocation7 + $0x258] sm:$0x7] }
  0x53   :  { %1467 = vmatprep.subr.mxu1 %v179_v41  ;;  %1433 = vmatpush3.msra.mxu0 %v131_v42  ;;  %v110_v63 = vld [vmem:[#allocation2 + $0x8] sm:$0xff]  ;;  %v452_v6 = vld [vmem:[#allocation8 + $0x78] sm:$0xff]  ;;  %v467_v8 = vld [vmem:[#allocation8 + $0xf0] sm:$0xff] }
  0x54   :  { %1468 = vmatpush3.msra.mxu1 %v163_v43  ;;  %1434 = vmatprep.subr.mxu0 %v146_v44  ;;  %v158_v0 = vld [vmem:[#allocation7 + $0x100] sm:$0xff]  ;;  %v200_v9 = vld [vmem:[#allocation7 + $0x250] sm:$0xff]  ;;  %v466_v11 = vld [vmem:[#allocation8 + $0xe8] sm:$0xff] }
  0x55   :  { %1469 = vmatprep.subr.mxu1 %v178_v45  ;;  %1435 = vmatpush3.msra.mxu0 %v130_v46  ;;  %v451_v10 = vld [vmem:[#allocation8 + $0x70] sm:$0xff]  ;;  %v199_v12 = vld [vmem:[#allocation7 + $0x248] sm:$0xff]  ;;  %v465_v14 = vld [vmem:[#allocation8 + $0xe0] sm:$0xff] }
  0x56   :  { %1470 = vmatpush3.msra.mxu1 %v162_v47  ;;  %1436 = vmatprep.subr.mxu0 %v145_v48  ;;  %v450_v13 = vld [vmem:[#allocation8 + $0x68] sm:$0xff]  ;;  %v198_v15 = vld [vmem:[#allocation7 + $0x240] sm:$0xff]  ;;  %v464_v17 = vld [vmem:[#allocation8 + $0xd8] sm:$0xff] }
  0x57   :  { %1471 = vmatprep.subr.mxu1 %v177_v49  ;;  %1437 = vmatpush3.msra.mxu0 %v129_v50  ;;  %v449_v16 = vld [vmem:[#allocation8 + $0x60] sm:$0xff]  ;;  %v197_v18 = vld [vmem:[#allocation7 + $0x238] sm:$0xff]  ;;  %v463_v20 = vld [vmem:[#allocation8 + $0xd0] sm:$0xff] }
  0x58   :  { %1472 = vmatpush3.msra.mxu1 %v161_v51  ;;  %1438 = vmatprep.subr.mxu0 %v144_v52  ;;  %v448_v19 = vld [vmem:[#allocation8 + $0x58] sm:$0xff]  ;;  %v196_v21 = vld [vmem:[#allocation7 + $0x230] sm:$0xff]  ;;  %v462_v23 = vld [vmem:[#allocation8 + $0xc8] sm:$0xff] }
  0x59   :  { %1473 = vmatprep.subr.mxu1 %v176_v53  ;;  %1439 = vmatpush3.msra.mxu0 %v128_v54  ;;  %v447_v22 = vld [vmem:[#allocation8 + $0x50] sm:$0xff]  ;;  %v195_v24 = vld [vmem:[#allocation7 + $0x228] sm:$0xff]  ;;  %v461_v26 = vld [vmem:[#allocation8 + $0xc0] sm:$0xff] }
  0x5a   :  { %1474 = vmatpush3.msra.mxu1 %v160_v55  ;;  %1440 = vmatprep.subr.mxu0 %v143_v56  ;;  %v446_v25 = vld [vmem:[#allocation8 + $0x48] sm:$0xff]  ;;  %v194_v27 = vld [vmem:[#allocation7 + $0x220] sm:$0xff]  ;;  %v460_v29 = vld [vmem:[#allocation8 + $0xb8] sm:$0xff] }
  0x5b   :  { %1475 = vmatprep.subr.mxu1 %v175_v57  ;;  %1441 = vmatpush3.msra.mxu0 %v127_v58  ;;  %v445_v28 = vld [vmem:[#allocation8 + $0x40] sm:$0xff]  ;;  %v193_v30 = vld [vmem:[#allocation7 + $0x218] sm:$0xff]  ;;  %v459_v32 = vld [vmem:[#allocation8 + $0xb0] sm:$0xff] }
  0x5c   :  { %1476 = vmatpush3.msra.mxu1 %v159_v59  ;;  %1442 = vmatprep.subr.mxu0 %v142_v60  ;;  %v444_v31 = vld [vmem:[#allocation8 + $0x38] sm:$0xff]  ;;  %v192_v33 = vld [vmem:[#allocation7 + $0x210] sm:$0xff]  ;;  %v458_v35 = vld [vmem:[#allocation8 + $0xa8] sm:$0xff] }
  0x5d   :  { %1477 = vmatprep.subr.mxu1 %v174_v61  ;;  %1443 = vmatpush3.msra.mxu0 %v126_v62  ;;  %v443_v34 = vld [vmem:[#allocation8 + $0x30] sm:$0xff]  ;;  %v191_v36 = vld [vmem:[#allocation7 + $0x208] sm:$0xff]  ;;  %v457_v38 = vld [vmem:[#allocation8 + $0xa0] sm:$0xff] }
  0x5e   :  { %281 = vmatprep.mubr.f32.mxu0 %v110_v63  ;;  %1478 = vmatpush3.msra.mxu1 %v158_v0  ;;  %v442_v37 = vld [vmem:[#allocation8 + $0x28] sm:$0xff]  ;;  %v190_v39 = vld [vmem:[#allocation7 + $0x200] sm:$0xff]  ;;  %v113_v41 = vld [vmem:[#allocation2 + $0x20] sm:$0xff] }
  0x5f   :  { %282 = vmatmul.mubr.f32.vlgmr.msra.gmra.mxu0 %v109_v1  ;;  %351 = vmatprep.mubr.f32.mxu1 %v112_v2  ;;  %v441_v40 = vld [vmem:[#allocation8 + $0x20] sm:$0xff]  ;;  %v456_v42 = vld [vmem:[#allocation8 + $0x98] sm:$0xff]  ;;  %v455_v46 = vld [vmem:[#allocation8 + $0x90] sm:$0xff] }
  0x60   :  { %1696 = vmatprep.subr.mxu0 %v1940_v7  ;;  %1495 = vmatprep.subr.mxu1 %v468_v3  ;;  %v500_v43 = vld [vmem:[#allocation8 + $0x1f8] sm:$0xff]  ;;  %v499_v47 = vld [vmem:[#allocation8 + $0x1f0] sm:$0xff]  ;;  %v454_v50 = vld [vmem:[#allocation8 + $0x88] sm:$0xff] }
  0x61   :  { %352 = vmatmul.mubr.f32.vlgmr.msra.gmra.mxu1 %v111_v4  ;;  %1697 = vmatpush3.msk.msra.mxu0 %vm213_vm0, %v201_v5  ;;  %v440_v44 = vld [vmem:[#allocation8 + $0x18] sm:$0xff]  ;;  %v439_v48 = vld [vmem:[#allocation8 + $0x10] sm:$0xff]  ;;  %v498_v51 = vld [vmem:[#allocation8 + $0x1e8] sm:$0xff] }
  0x62   :  { %1496 = vmatpush3.msra.mxu1 %v452_v6  ;;  %1698 = vmatprep.subr.mxu0 %v1940_v7  ;;  %v484_v45 = vld [vmem:[#allocation8 + $0x178] sm:$0xff]  ;;  %v483_v49 = vld [vmem:[#allocation8 + $0x170] sm:$0xff]  ;;  %v438_v52 = vld [vmem:[#allocation8 + $0x8] sm:$0xff] }
  0x63   :  { %1497 = vmatprep.subr.mxu1 %v467_v8  ;;  %1699 = vmatpush3.msra.mxu0 %v200_v9  ;;  %v482_v53 = vld [vmem:[#allocation8 + $0x168] sm:$0xff]  ;;  %v453_v54 = vld [vmem:[#allocation8 + $0x80] sm:$0xff]  ;;  %v496_v59 = vld [vmem:[#allocation8 + $0x1d8] sm:$0xff] }
  0x64   :  { %1498 = vmatpush3.msra.mxu1 %v451_v10  ;;  %1700 = vmatprep.subr.mxu0 %v1940_v7  ;;  %v497_v55 = vld [vmem:[#allocation8 + $0x1e0] sm:$0xff]  ;;  %v532_v60 = vld [vmem:[#allocation8 + $0x2f8] sm:$0xff]  ;;  %v495_v0 = vld [vmem:[#allocation8 + $0x1d0] sm:$0xff] }
  0x65   :  { %1499 = vmatprep.subr.mxu1 %v466_v11  ;;  %1701 = vmatpush3.msra.mxu0 %v199_v12  ;;  %v437_v56 = vld [vmem:[#allocation8] sm:$0xff]  ;;  %v114_v61 = vld [vmem:[%s2505_s1] sm:$0xff]  ;;  %v531_v1 = vld [vmem:[#allocation8 + $0x2f0] sm:$0xff] }
  0x66   :  { %1500 = vmatpush3.msra.mxu1 %v450_v13  ;;  %1702 = vmatprep.subr.mxu0 %v1940_v7  ;;  %v481_v57 = vld [vmem:[#allocation8 + $0x160] sm:$0xff]  ;;  %v480_v62 = vld [vmem:[#allocation8 + $0x158] sm:$0xff]  ;;  %v479_v2 = vld [vmem:[#allocation8 + $0x150] sm:$0xff] }
  0x67   :  { %1501 = vmatprep.subr.mxu1 %v465_v14  ;;  %1703 = vmatpush3.msra.mxu0 %v198_v15  ;;  %v115_v58 = vld [vmem:[%s2505_s1 + $0x8] sm:$0xff]  ;;  %v516_v63 = vld [vmem:[#allocation8 + $0x278] sm:$0xff]  ;;  %v515_v3 = vld [vmem:[#allocation8 + $0x270] sm:$0xff] }
  0x68   :  { %1502 = vmatpush3.msra.mxu1 %v449_v16  ;;  %1704 = vmatprep.subr.mxu0 %v1940_v7  ;;  %v494_v4 = vld [vmem:[#allocation8 + $0x1c8] sm:$0xff]  ;;  %v493_v9 = vld [vmem:[#allocation8 + $0x1c0] sm:$0xff]  ;;  %v492_v13 = vld [vmem:[#allocation8 + $0x1b8] sm:$0xff] }
  0x69   :  { %1503 = vmatprep.subr.mxu1 %v464_v17  ;;  %1705 = vmatpush3.msra.mxu0 %v197_v18  ;;  %v530_v5 = vld [vmem:[#allocation8 + $0x2e8] sm:$0xff]  ;;  %v529_v10 = vld [vmem:[#allocation8 + $0x2e0] sm:$0xff]  ;;  %v528_v14 = vld [vmem:[#allocation8 + $0x2d8] sm:$0xff] }
  0x6a   :  { %1504 = vmatpush3.msra.mxu1 %v448_v19  ;;  %1706 = vmatprep.subr.mxu0 %v1940_v7  ;;  %v478_v6 = vld [vmem:[#allocation8 + $0x148] sm:$0xff]  ;;  %v477_v11 = vld [vmem:[#allocation8 + $0x140] sm:$0xff]  ;;  %v476_v15 = vld [vmem:[#allocation8 + $0x138] sm:$0xff] }
  0x6b   :  { %1505 = vmatprep.subr.mxu1 %v463_v20  ;;  %1707 = vmatpush3.msra.mxu0 %v196_v21  ;;  %v514_v8 = vld [vmem:[#allocation8 + $0x268] sm:$0xff]  ;;  %v513_v12 = vld [vmem:[#allocation8 + $0x260] sm:$0xff]  ;;  %v512_v16 = vld [vmem:[#allocation8 + $0x258] sm:$0xff] }
  0x6c   :  { %1506 = vmatpush3.msra.mxu1 %v447_v22  ;;  %1708 = vmatprep.subr.mxu0 %v1940_v7  ;;  %v491_v17 = vld [vmem:[#allocation8 + $0x1b0] sm:$0xff]  ;;  %v490_v21 = vld [vmem:[#allocation8 + $0x1a8] sm:$0xff] }
  0x6d   :  { %1507 = vmatprep.subr.mxu1 %v462_v23  ;;  %1709 = vmatpush3.msra.mxu0 %v195_v24  ;;  %v527_v18 = vld [vmem:[#allocation8 + $0x2d0] sm:$0xff]  ;;  %v526_v22 = vld [vmem:[#allocation8 + $0x2c8] sm:$0xff] }
  0x6e   :  { %1508 = vmatpush3.msra.mxu1 %v446_v25  ;;  %1710 = vmatprep.subr.mxu0 %v1940_v7  ;;  %v475_v19 = vld [vmem:[#allocation8 + $0x130] sm:$0xff]  ;;  %v474_v23 = vld [vmem:[#allocation8 + $0x128] sm:$0xff]  ;;  %v489_v25 = vld [vmem:[#allocation8 + $0x1a0] sm:$0xff] }
  0x6f   :  { %1509 = vmatprep.subr.mxu1 %v461_v26  ;;  %1711 = vmatpush3.msra.mxu0 %v194_v27  ;;  %v511_v20 = vld [vmem:[#allocation8 + $0x250] sm:$0xff]  ;;  %v510_v24 = vld [vmem:[#allocation8 + $0x248] sm:$0xff]  ;;  %v525_v26 = vld [vmem:[#allocation8 + $0x2c0] sm:$0xff] }
  0x70   :  { %1510 = vmatpush3.msra.mxu1 %v445_v28  ;;  %1712 = vmatprep.subr.mxu0 %v1940_v7  ;;  %v473_v27 = vld [vmem:[#allocation8 + $0x120] sm:$0xff] }
  0x71   :  { %1511 = vmatprep.subr.mxu1 %v460_v29  ;;  %1713 = vmatpush3.msra.mxu0 %v193_v30  ;;  %v509_v28 = vld [vmem:[#allocation8 + $0x240] sm:$0xff]  ;;  %v488_v29 = vld [vmem:[#allocation8 + $0x198] sm:$0xff] }
  0x72   :  { %1512 = vmatpush3.msra.mxu1 %v444_v31  ;;  %1714 = vmatprep.subr.mxu0 %v1940_v7  ;;  %v524_v30 = vld [vmem:[#allocation8 + $0x2b8] sm:$0xff] }
  0x73   :  { %1513 = vmatprep.subr.mxu1 %v459_v32  ;;  %1715 = vmatpush3.msra.mxu0 %v192_v33  ;;  %v472_v31 = vld [vmem:[#allocation8 + $0x118] sm:$0xff]  ;;  %v487_v33 = vld [vmem:[#allocation8 + $0x190] sm:$0xff] }
  0x74   :  { %1514 = vmatpush3.msra.mxu1 %v443_v34  ;;  %1716 = vmatprep.subr.mxu0 %v1940_v7  ;;  %v508_v32 = vld [vmem:[#allocation8 + $0x238] sm:$0xff]  ;;  %v523_v34 = vld [vmem:[#allocation8 + $0x2b0] sm:$0xff] }
  0x75   :  { %1515 = vmatprep.subr.mxu1 %v458_v35  ;;  %1717 = vmatpush3.msra.mxu0 %v191_v36  ;;  %v471_v35 = vld [vmem:[#allocation8 + $0x110] sm:$0xff] }
  0x76   :  { %1516 = vmatpush3.msra.mxu1 %v442_v37  ;;  %1718 = vmatprep.subr.mxu0 %v1940_v7  ;;  %v507_v36 = vld [vmem:[#allocation8 + $0x230] sm:$0xff]  ;;  %v486_v37 = vld [vmem:[#allocation8 + $0x188] sm:$0xff] }
  0x77   :  { %1517 = vmatprep.subr.mxu1 %v457_v38  ;;  %1719 = vmatpush3.msra.mxu0 %v190_v39  ;;  %v522_v38 = vld [vmem:[#allocation8 + $0x2a8] sm:$0xff] }
  0x78   :  { %1720 = vmatprep.mubr.msk.f32.mxu0 %vm1941_vm2, %v1940_v7  ;;  %1518 = vmatpush3.msra.mxu1 %v441_v40  ;;  %v470_v39 = vld [vmem:[#allocation8 + $0x108] sm:$0xff] }
  0x79   :  { %1721 = vmatmul.mubr.msk.f32.vlgmr.msra.gmra.mxu0 %vm209_vm1, %v113_v41  ;;  %1519 = vmatprep.subr.mxu1 %v456_v42  ;;  %v506_v40 = vld [vmem:[#allocation8 + $0x228] sm:$0xff]  ;;  %v485_v41 = vld [vmem:[#allocation8 + $0x180] sm:$0xff] }
  0x7a   :  { %1530 = vmatprep.subr.mxu0 %v500_v43  ;;  %1520 = vmatpush3.msra.mxu1 %v440_v44  ;;  %v521_v42 = vld [vmem:[#allocation8 + $0x2a0] sm:$0xff]  ;;  %v117_v44 = vld [vmem:[%s2505_s1 + $0x18] sm:$0xff] }
  0x7b   :  { %1531 = vmatpush3.msra.mxu0 %v484_v45  ;;  %1521 = vmatprep.subr.mxu1 %v455_v46  ;;  %v469_v43 = vld [vmem:[#allocation8 + $0x100] sm:$0xff]  ;;  %v116_v46 = vld [vmem:[%s2505_s1 + $0x10] sm:$0xff] }
  0x7c   :  { %1532 = vmatprep.subr.mxu0 %v499_v47  ;;  %1522 = vmatpush3.msra.mxu1 %v439_v48  ;;  %v505_v45 = vld [vmem:[#allocation8 + $0x220] sm:$0xff]  ;;  %v520_v47 = vld [vmem:[#allocation8 + $0x298] sm:$0xff] }
  0x7d   :  { %1533 = vmatpush3.msra.mxu0 %v483_v49  ;;  %1523 = vmatprep.subr.mxu1 %v454_v50  ;;  %v504_v48 = vld [vmem:[#allocation8 + $0x218] sm:$0xff]  ;;  %v519_v50 = vld [vmem:[#allocation8 + $0x290] sm:$0xff] }
  0x7e   :  { %1534 = vmatprep.subr.mxu0 %v498_v51  ;;  %1524 = vmatpush3.msra.mxu1 %v438_v52  ;;  %v548_v49 = vld [vmem:[#allocation8 + $0x378] sm:$0xff]  ;;  %v503_v51 = vld [vmem:[#allocation8 + $0x210] sm:$0xff] }
  0x7f   :  { %1535 = vmatpush3.msra.mxu0 %v482_v53  ;;  %1525 = vmatprep.subr.mxu1 %v453_v54  ;;  %v547_v52 = vld [vmem:[#allocation8 + $0x370] sm:$0xff]  ;;  %v518_v53 = vld [vmem:[#allocation8 + $0x288] sm:$0xff] }
  0x80   :  { %1536 = vmatprep.subr.mxu0 %v497_v55  ;;  %1526 = vmatpush3.msra.mxu1 %v437_v56  ;;  %v502_v54 = vld [vmem:[#allocation8 + $0x208] sm:$0xff]  ;;  %v517_v56 = vld [vmem:[#allocation8 + $0x280] sm:$0xff] }
  0x81   :  { %1537 = vmatpush3.msra.mxu0 %v481_v57  ;;  %629 = vmatprep.mubr.f32.mxu1 %v115_v58  ;;  %v546_v55 = vld [vmem:[#allocation8 + $0x368] sm:$0xff]  ;;  %v501_v57 = vld [vmem:[#allocation8 + $0x200] sm:$0xff] }
  0x82   :  { %1538 = vmatprep.subr.mxu0 %v496_v59  ;;  %1565 = vmatprep.subr.mxu1 %v532_v60  ;;  %v119_v58 = vld [vmem:[%s2505_s1 + $0x28] sm:$0xff]  ;;  %v118_v60 = vld [vmem:[%s2505_s1 + $0x20] sm:$0xff] }
  0x83   :  { %630 = vmatmul.mubr.f32.vlgmr.msra.gmra.mxu1 %v114_v61  ;;  %1539 = vmatpush3.msra.mxu0 %v480_v62  ;;  %v545_v59 = vld [vmem:[#allocation8 + $0x360] sm:$0xff]  ;;  %v121_v61 = vld [vmem:[%s2505_s1 + $0x38] sm:$0xff]  ;;  %v544_v62 = vld [vmem:[#allocation8 + $0x358] sm:$0xff] }
  0x84   :  { %1566 = vmatpush3.msra.mxu1 %v516_v63  ;;  %1540 = vmatprep.subr.mxu0 %v495_v0  ;;  %v886_v63 = vld [vmem:[%s2511_s7 + $0xf8] sm:$0xff] }
  0x85   :  { %1567 = vmatprep.subr.mxu1 %v531_v1  ;;  %1541 = vmatpush3.msra.mxu0 %v479_v2  ;;  %v870_v0 = vld [vmem:[%s2511_s7 + $0x78] sm:$0xff]  ;;  %v885_v2 = vld [vmem:[%s2511_s7 + $0xf0] sm:$0xff] }
  0x86   :  { %1568 = vmatpush3.msra.mxu1 %v515_v3  ;;  %1542 = vmatprep.subr.mxu0 %v494_v4  ;;  %v543_v1 = vld [vmem:[#allocation8 + $0x350] sm:$0xff]  ;;  %v869_v3 = vld [vmem:[%s2511_s7 + $0x70] sm:$0xff] }
  0x87   :  { %1569 = vmatprep.subr.mxu1 %v530_v5  ;;  %1543 = vmatpush3.msra.mxu0 %v478_v6  ;;  %v542_v4 = vld [vmem:[#allocation8 + $0x348] sm:$0xff]  ;;  %v884_v5 = vld [vmem:[%s2511_s7 + $0xe8] sm:$0xff] }
  0x88   :  { %1570 = vmatpush3.msra.mxu1 %v514_v8  ;;  %1544 = vmatprep.subr.mxu0 %v493_v9  ;;  %v868_v6 = vld [vmem:[%s2511_s7 + $0x68] sm:$0xff]  ;;  %v883_v9 = vld [vmem:[%s2511_s7 + $0xe0] sm:$0xff] }
  0x89   :  { %1571 = vmatprep.subr.mxu1 %v529_v10  ;;  %1545 = vmatpush3.msra.mxu0 %v477_v11  ;;  %v541_v8 = vld [vmem:[#allocation8 + $0x340] sm:$0xff]  ;;  %v867_v10 = vld [vmem:[%s2511_s7 + $0x60] sm:$0xff] }
  0x8a   :  { %1572 = vmatpush3.msra.mxu1 %v513_v12  ;;  %1546 = vmatprep.subr.mxu0 %v492_v13  ;;  %v540_v11 = vld [vmem:[#allocation8 + $0x338] sm:$0xff]  ;;  %v882_v12 = vld [vmem:[%s2511_s7 + $0xd8] sm:$0xff] }
  0x8b   :  { %1573 = vmatprep.subr.mxu1 %v528_v14  ;;  %1547 = vmatpush3.msra.mxu0 %v476_v15  ;;  %v866_v13 = vld [vmem:[%s2511_s7 + $0x58] sm:$0xff]  ;;  %v881_v15 = vld [vmem:[%s2511_s7 + $0xd0] sm:$0xff] }
  0x8c   :  { %1574 = vmatpush3.msra.mxu1 %v512_v16  ;;  %1548 = vmatprep.subr.mxu0 %v491_v17  ;;  %v539_v14 = vld [vmem:[#allocation8 + $0x330] sm:$0xff]  ;;  %v865_v16 = vld [vmem:[%s2511_s7 + $0x50] sm:$0xff] }
  0x8d   :  { %1575 = vmatprep.subr.mxu1 %v527_v18  ;;  %1549 = vmatpush3.msra.mxu0 %v475_v19  ;;  %v538_v17 = vld [vmem:[#allocation8 + $0x328] sm:$0xff]  ;;  %v880_v18 = vld [vmem:[%s2511_s7 + $0xc8] sm:$0xff] }
  0x8e   :  { %1576 = vmatpush3.msra.mxu1 %v511_v20  ;;  %1550 = vmatprep.subr.mxu0 %v490_v21  ;;  %v864_v19 = vld [vmem:[%s2511_s7 + $0x48] sm:$0xff]  ;;  %v879_v21 = vld [vmem:[%s2511_s7 + $0xc0] sm:$0xff] }
  0x8f   :  { %1577 = vmatprep.subr.mxu1 %v526_v22  ;;  %1551 = vmatpush3.msra.mxu0 %v474_v23  ;;  %v537_v20 = vld [vmem:[#allocation8 + $0x320] sm:$0xff]  ;;  %v863_v22 = vld [vmem:[%s2511_s7 + $0x40] sm:$0xff] }
  0x90   :  { %1578 = vmatpush3.msra.mxu1 %v510_v24  ;;  %1552 = vmatprep.subr.mxu0 %v489_v25  ;;  %v536_v23 = vld [vmem:[#allocation8 + $0x318] sm:$0xff]  ;;  %v878_v24 = vld [vmem:[%s2511_s7 + $0xb8] sm:$0xff] }
  0x91   :  { %1579 = vmatprep.subr.mxu1 %v525_v26  ;;  %1553 = vmatpush3.msra.mxu0 %v473_v27  ;;  %v862_v25 = vld [vmem:[%s2511_s7 + $0x38] sm:$0xff]  ;;  %v877_v27 = vld [vmem:[%s2511_s7 + $0xb0] sm:$0xff] }
  0x92   :  { %1580 = vmatpush3.msra.mxu1 %v509_v28  ;;  %1554 = vmatprep.subr.mxu0 %v488_v29  ;;  %v535_v26 = vld [vmem:[#allocation8 + $0x310] sm:$0xff]  ;;  %v861_v28 = vld [vmem:[%s2511_s7 + $0x30] sm:$0xff] }
  0x93   :  { %1581 = vmatprep.subr.mxu1 %v524_v30  ;;  %1555 = vmatpush3.msra.mxu0 %v472_v31  ;;  %v534_v29 = vld [vmem:[#allocation8 + $0x308] sm:$0xff]  ;;  %v876_v30 = vld [vmem:[%s2511_s7 + $0xa8] sm:$0xff] }
  0x94   :  { %1582 = vmatpush3.msra.mxu1 %v508_v32  ;;  %1556 = vmatprep.subr.mxu0 %v487_v33  ;;  %v860_v31 = vld [vmem:[%s2511_s7 + $0x28] sm:$0xff]  ;;  %v875_v33 = vld [vmem:[%s2511_s7 + $0xa0] sm:$0xff] }
  0x95   :  { %1583 = vmatprep.subr.mxu1 %v523_v34  ;;  %1557 = vmatpush3.msra.mxu0 %v471_v35  ;;  %v533_v32 = vld [vmem:[#allocation8 + $0x300] sm:$0xff]  ;;  %v859_v34 = vld [vmem:[%s2511_s7 + $0x20] sm:$0xff] }
  0x96   :  { %1584 = vmatpush3.msra.mxu1 %v507_v36  ;;  %1558 = vmatprep.subr.mxu0 %v486_v37  ;;  %v549_v35 = vld [vmem:[#allocation8 + $0x380] sm:$0xf]  ;;  %v874_v36 = vld [vmem:[%s2511_s7 + $0x98] sm:$0xff]  ;;  %v120_v37 = vld [vmem:[%s2505_s1 + $0x30] sm:$0xff] }
  0x97   :  { %1585 = vmatprep.subr.mxu1 %v522_v38  ;;  %1559 = vmatpush3.msra.mxu0 %v470_v39  ;;  %v902_v38 = vld [vmem:[%s2511_s7 + $0x178] sm:$0xff] }
  0x98   :  { %1586 = vmatpush3.msra.mxu1 %v506_v40  ;;  %1560 = vmatprep.subr.mxu0 %v485_v41  ;;  %v858_v39 = vld [vmem:[%s2511_s7 + $0x18] sm:$0xff]  ;;  %v873_v40 = vld [vmem:[%s2511_s7 + $0x90] sm:$0xff] }
  0x99   :  { %1587 = vmatprep.subr.mxu1 %v521_v42  ;;  %1561 = vmatpush3.msra.mxu0 %v469_v43  ;;  %v901_v41 = vld [vmem:[%s2511_s7 + $0x170] sm:$0xff]  ;;  %v872_v43 = vld [vmem:[%s2511_s7 + $0x88] sm:$0xff] }
  0x9a   :  { %699 = vmatprep.mubr.f32.mxu0 %v117_v44  ;;  %1588 = vmatpush3.msra.mxu1 %v505_v45  ;;  %v857_v42 = vld [vmem:[%s2511_s7 + $0x10] sm:$0xff]  ;;  %v900_v44 = vld [vmem:[%s2511_s7 + $0x168] sm:$0xff] }
  0x9b   :  { %700 = vmatmul.mubr.f32.vlgmr.msra.gmra.mxu0 %v116_v46  ;;  %1589 = vmatprep.subr.mxu1 %v520_v47  ;;  %v856_v45 = vld [vmem:[%s2511_s7 + $0x8] sm:$0xff]  ;;  %v871_v46 = vld [vmem:[%s2511_s7 + $0x80] sm:$0xff] }
  0x9c   :  { %775 = vmatprep.subr.mxu0 %v1940_v7  ;;  %1590 = vmatpush3.msra.mxu1 %v504_v48  ;;  %v899_v47 = vld [vmem:[%s2511_s7 + $0x160] sm:$0xff] }
  0x9d   :  { %776 = vmatpush1.msra.mxu0 %v548_v49  ;;  %1591 = vmatprep.subr.mxu1 %v519_v50  ;;  %v855_v48 = vld [vmem:[%s2511_s7] sm:$0xff]  ;;  %v123_v49 = vld [vmem:[#allocation5 + $0x8] sm:$0xff]  ;;  %v898_v50 = vld [vmem:[%s2511_s7 + $0x158] sm:$0xff] }
  0x9e   :  { %777 = vmatprep.subr.mxu0 %v1940_v7  ;;  %1592 = vmatpush3.msra.mxu1 %v503_v51  ;;  %v122_v51 = vld [vmem:[#allocation5] sm:$0xff] }
  0x9f   :  { %778 = vmatpush1.msra.mxu0 %v547_v52  ;;  %1593 = vmatprep.subr.mxu1 %v518_v53  ;;  %v125_v52 = vld [vmem:[#allocation5 + $0x18] sm:$0xff]  ;;  %v897_v53 = vld [vmem:[%s2511_s7 + $0x150] sm:$0xff] }
  0xa0   :  { %779 = vmatprep.subr.mxu0 %v1940_v7  ;;  %1594 = vmatpush3.msra.mxu1 %v502_v54  ;;  %v896_v54 = vld [vmem:[%s2511_s7 + $0x148] sm:$0xff] }
  0xa1   :  { %780 = vmatpush1.msra.mxu0 %v546_v55  ;;  %1595 = vmatprep.subr.mxu1 %v517_v56  ;;  %v895_v55 = vld [vmem:[%s2511_s7 + $0x140] sm:$0xff]  ;;  %v894_v56 = vld [vmem:[%s2511_s7 + $0x138] sm:$0xff] }
  0xa2   :  { %781 = vmatprep.subr.mxu0 %v1940_v7  ;;  %1596 = vmatpush3.msra.mxu1 %v501_v57  ;;  %v893_v57 = vld [vmem:[%s2511_s7 + $0x130] sm:$0xff] }
  0xa3   :  { %769 = vmatprep.mubr.f32.mxu1 %v119_v58  ;;  %782 = vmatpush1.msra.mxu0 %v545_v59  ;;  %v892_v58 = vld [vmem:[%s2511_s7 + $0x128] sm:$0xff]  ;;  %v891_v59 = vld [vmem:[%s2511_s7 + $0x120] sm:$0xff] }
  0xa4   :  { %770 = vmatmul.mubr.f32.vlgmr.msra.gmra.mxu1 %v118_v60  ;;  %783 = vmatprep.subr.mxu0 %v1940_v7  ;;  %v890_v60 = vld [vmem:[%s2511_s7 + $0x118] sm:$0xff] }
  0xa5   :  { %1405 = vmatprep.mubr.msk.f32.mxu0 %vm557_vm3, %v121_v61  ;;  %784 = vmatpush1.msra.mxu0 %v544_v62  ;;  %v889_v61 = vld [vmem:[%s2511_s7 + $0x110] sm:$0xff]  ;;  %v888_v62 = vld [vmem:[%s2511_s7 + $0x108] sm:$0xff] }
  0xa6   :  { %1600 = vmatprep.subr.mxu1 %v886_v63  ;;  %785 = vmatprep.subr.mxu0 %v1940_v7  ;;  %v887_v63 = vld [vmem:[%s2511_s7 + $0x100] sm:$0xff] }
  0xa7   :  { %1601 = vmatpush3.msra.mxu1 %v870_v0  ;;  %786 = vmatpush1.msra.mxu0 %v543_v1  ;;  %v917_v0 = vld [vmem:[%s2511_s7 + $0x1f0] sm:$0xf]  ;;  %v916_v1 = vld [vmem:[%s2511_s7 + $0x1e8] sm:$0xff] }
  0xa8   :  { %1602 = vmatprep.subr.mxu1 %v885_v2  ;;  %787 = vmatprep.subr.mxu0 %v1940_v7  ;;  %v915_v2 = vld [vmem:[%s2511_s7 + $0x1e0] sm:$0xff] }
  0xa9   :  { %1603 = vmatpush3.msra.mxu1 %v869_v3  ;;  %788 = vmatpush1.msra.mxu0 %v542_v4  ;;  %v914_v3 = vld [vmem:[%s2511_s7 + $0x1d8] sm:$0xff]  ;;  %v913_v4 = vld [vmem:[%s2511_s7 + $0x1d0] sm:$0xff] }
  0xaa   :  { %1604 = vmatprep.subr.mxu1 %v884_v5  ;;  %789 = vmatprep.subr.mxu0 %v1940_v7  ;;  %v912_v5 = vld [vmem:[%s2511_s7 + $0x1c8] sm:$0xff] }
  0xab   :  { %1605 = vmatpush3.msra.mxu1 %v868_v6  ;;  %790 = vmatpush1.msra.mxu0 %v541_v8  ;;  %v911_v6 = vld [vmem:[%s2511_s7 + $0x1c0] sm:$0xff]  ;;  %v910_v8 = vld [vmem:[%s2511_s7 + $0x1b8] sm:$0xff] }
  0xac   :  { %1606 = vmatprep.subr.mxu1 %v883_v9  ;;  %791 = vmatprep.subr.mxu0 %v1940_v7  ;;  %v909_v9 = vld [vmem:[%s2511_s7 + $0x1b0] sm:$0xff] }
  0xad   :  { %1607 = vmatpush3.msra.mxu1 %v867_v10  ;;  %792 = vmatpush1.msra.mxu0 %v540_v11  ;;  %v908_v10 = vld [vmem:[%s2511_s7 + $0x1a8] sm:$0xff]  ;;  %v907_v11 = vld [vmem:[%s2511_s7 + $0x1a0] sm:$0xff] }
  0xae   :  { %1608 = vmatprep.subr.mxu1 %v882_v12  ;;  %793 = vmatprep.subr.mxu0 %v1940_v7  ;;  %v906_v12 = vld [vmem:[%s2511_s7 + $0x198] sm:$0xff] }
  0xaf   :  { %1609 = vmatpush3.msra.mxu1 %v866_v13  ;;  %794 = vmatpush1.msra.mxu0 %v539_v14  ;;  %v905_v13 = vld [vmem:[%s2511_s7 + $0x190] sm:$0xff]  ;;  %v904_v14 = vld [vmem:[%s2511_s7 + $0x188] sm:$0xff] }
  0xb0   :  { %1610 = vmatprep.subr.mxu1 %v881_v15  ;;  %795 = vmatprep.subr.mxu0 %v1940_v7  ;;  %v903_v15 = vld [vmem:[%s2511_s7 + $0x180] sm:$0xff]  ;;  %s1389_s7 = sshll.u32 %s1942_s2, 4  ;;  %s1390_s7 = int_to_ptr.vmem [resolvable:$true] %s1389_s7 }
  0xb1   :  { %1611 = vmatpush3.msra.mxu1 %v865_v16  ;;  %796 = vmatpush1.msra.mxu0 %v538_v17  ;;  %v124_v16 = vld [vmem:[#allocation5 + $0x10] sm:$0xff]  ;;  %s1905_s22 = scalar_lea.vmem %s1390_s7, 128  ;;  %p1910_p12 = scmp.lt.s32.totalorder %s1390_s7, %s1390_s7 }
  0xb2   :  { %1612 = vmatprep.subr.mxu1 %v880_v18  ;;  %797 = vmatprep.subr.mxu0 %v1940_v7  ;;  %v1113_v17 = vld [vmem:[%s2513_s9 + $0xf8] sm:$0xff]  ;;  %p1906_p11 = scmp.ne.s32.totalorder %s1390_s7, %s1905_s22  ;;  %p1911_p13 = scmp.lt.s32.totalorder %s1905_s22, %s1905_s22 }
  0xb3   :  { %1613 = vmatpush3.msra.mxu1 %v864_v19  ;;  %798 = vmatpush1.msra.mxu0 %v537_v20  ;;  %v1097_v18 = vld [vmem:[%s2513_s9 + $0x78] sm:$0xff]  ;;  %v1112_v19 = vld [vmem:[%s2513_s9 + $0xf0] sm:$0xff] }
  0xb4   :  { %1614 = vmatprep.subr.mxu1 %v879_v21  ;;  %799 = vmatprep.subr.mxu0 %v1940_v7  ;;  %v1096_v20 = vld [vmem:[%s2513_s9 + $0x70] sm:$0xff]  ;;  %v1111_v21 = vld [vmem:[%s2513_s9 + $0xe8] sm:$0xff]  ;;  %p1912_p0 = por %p1911_p13, %p1910_p12 }
  0xb5   :  { %1615 = vmatpush3.msra.mxu1 %v863_v22  ;;  %800 = vmatpush1.msra.mxu0 %v536_v23  ;;  %v1095_v22 = vld [vmem:[%s2513_s9 + $0x68] sm:$0xff]  ;;  %v1110_v23 = vld [vmem:[%s2513_s9 + $0xe0] sm:$0xff] }
  0xb6   :  { %1616 = vmatprep.subr.mxu1 %v878_v24  ;;  %801 = vmatprep.subr.mxu0 %v1940_v7  ;;  %v1094_v24 = vld [vmem:[%s2513_s9 + $0x60] sm:$0xff]  ;;  %p1913_p1 = pnand %p1912_p0, %p1906_p11 }
  0xb7   :  { %1617 = vmatpush3.msra.mxu1 %v862_v25  ;;  %802 = vmatpush1.msra.mxu0 %v535_v26  ;;  %v1109_v25 = vld [vmem:[%s2513_s9 + $0xd8] sm:$0xff] }
  0xb8   :  { %1618 = vmatprep.subr.mxu1 %v877_v27  ;;  %803 = vmatprep.subr.mxu0 %v1940_v7  ;;  %v1093_v26 = vld [vmem:[%s2513_s9 + $0x58] sm:$0xff]  ;;  %v1108_v27 = vld [vmem:[%s2513_s9 + $0xd0] sm:$0xff] }
  0xb9   :  { %1619 = vmatpush3.msra.mxu1 %v861_v28  ;;  %804 = vmatpush1.msra.mxu0 %v534_v29  ;;  %v1092_v28 = vld [vmem:[%s2513_s9 + $0x50] sm:$0xff]  ;;  %v1107_v29 = vld [vmem:[%s2513_s9 + $0xc8] sm:$0xff] }
  0xba   :  { %1620 = vmatprep.subr.mxu1 %v876_v30  ;;  %805 = vmatprep.subr.mxu0 %v1940_v7  ;;  %v1091_v30 = vld [vmem:[%s2513_s9 + $0x48] sm:$0xff] }
  0xbb   :  { %1621 = vmatpush3.msra.mxu1 %v860_v31  ;;  %806 = vmatpush1.msra.mxu0 %v533_v32  ;;  %v1106_v31 = vld [vmem:[%s2513_s9 + $0xc0] sm:$0xff] }
  0xbc   :  { %1622 = vmatprep.subr.mxu1 %v875_v33  ;;  %837 = vmatprep.subr.mxu0 %v1940_v7  ;;  %v1090_v32 = vld [vmem:[%s2513_s9 + $0x40] sm:$0xff]  ;;  %v1105_v33 = vld [vmem:[%s2513_s9 + $0xb8] sm:$0xff] }
  0xbd   :  { %1623 = vmatpush3.msra.mxu1 %v859_v34  ;;  %1404 = vmatpush2.msk.msra.mxu0 %vm561_vm4, %v549_v35  ;;  %v1089_v35 = vld [vmem:[%s2513_s9 + $0x38] sm:$0xff] }
  0xbe   :  { %1624 = vmatprep.subr.mxu1 %v874_v36  ;;  %840 = vmatmul.mubr.f32.vlgmr.msra.gmra.mxu0 %v120_v37  ;;  %v1104_v36 = vld [vmem:[%s2513_s9 + $0xb0] sm:$0xff] }
  0xbf   :  { %1002 = vmatprep.subr.mxu0 %v1940_v7  ;;  %1625 = vmatpush3.msra.mxu1 %v858_v39 }
  0xc0   :  { %1003 = vmatpush1.msra.mxu0 %v902_v38  ;;  %1626 = vmatprep.subr.mxu1 %v873_v40  ;;  %v1088_v38 = vld [vmem:[%s2513_s9 + $0x30] sm:$0xff]  ;;  %v1103_v40 = vld [vmem:[%s2513_s9 + $0xa8] sm:$0xff] }
  0xc1   :  { %1004 = vmatprep.subr.mxu0 %v1940_v7  ;;  %1627 = vmatpush3.msra.mxu1 %v857_v42  ;;  %v1102_v42 = vld [vmem:[%s2513_s9 + $0xa0] sm:$0xff] }
  0xc2   :  { %1005 = vmatpush1.msra.mxu0 %v901_v41  ;;  %1628 = vmatprep.subr.mxu1 %v872_v43  ;;  %v1087_v41 = vld [vmem:[%s2513_s9 + $0x28] sm:$0xff]  ;;  %v1086_v43 = vld [vmem:[%s2513_s9 + $0x20] sm:$0xff] }
  0xc3   :  { %1006 = vmatprep.subr.mxu0 %v1940_v7  ;;  %1629 = vmatpush3.msra.mxu1 %v856_v45  ;;  %v1085_v45 = vld [vmem:[%s2513_s9 + $0x18] sm:$0xff] }
  0xc4   :  { %1007 = vmatpush1.msra.mxu0 %v900_v44  ;;  %1630 = vmatprep.subr.mxu1 %v871_v46  ;;  %v1101_v44 = vld [vmem:[%s2513_s9 + $0x98] sm:$0xff]  ;;  %v1100_v46 = vld [vmem:[%s2513_s9 + $0x90] sm:$0xff] }
  0xc5   :  { %1008 = vmatprep.subr.mxu0 %v1940_v7  ;;  %1631 = vmatpush3.msra.mxu1 %v855_v48  ;;  %v1099_v48 = vld [vmem:[%s2513_s9 + $0x88] sm:$0xff] }
  0xc6   :  { %1009 = vmatpush1.msra.mxu0 %v899_v47  ;;  %996 = vmatprep.mubr.f32.mxu1 %v123_v49  ;;  %v1084_v47 = vld [vmem:[%s2513_s9 + $0x10] sm:$0xff]  ;;  %v1083_v49 = vld [vmem:[%s2513_s9 + $0x8] sm:$0xff] }
  0xc7   :  { %1010 = vmatprep.subr.mxu0 %v1940_v7  ;;  %997 = vmatmul.mubr.f32.vlgmr.msra.gmra.mxu1 %v122_v51  ;;  %v1082_v51 = vld [vmem:[%s2513_s9] sm:$0xff] }
  0xc8   :  { %1011 = vmatpush1.msra.mxu0 %v898_v50  ;;  %1408 = vmatprep.mubr.msk.f32.mxu0 %vm925_vm5, %v125_v52  ;;  %v1098_v50 = vld [vmem:[%s2513_s9 + $0x80] sm:$0xff] }
  0xc9   :  { %1012 = vmatprep.subr.mxu0 %v1940_v7  ;;  %1635 = vmatprep.subr.mxu1 %v1113_v17 }
  0xca   :  { %1013 = vmatpush1.msra.mxu0 %v897_v53  ;;  %1636 = vmatpush3.msra.mxu1 %v1097_v18  ;;  %v1400_v53 = vld [vmem:[%s2508_s4] ss:$0 sm:$0xff] }
  0xcb   :  { %1014 = vmatprep.subr.mxu0 %v1940_v7  ;;  %1637 = vmatprep.subr.mxu1 %v1112_v19 }
  0xcc   :  { %1015 = vmatpush1.msra.mxu0 %v896_v54  ;;  %1638 = vmatpush3.msra.mxu1 %v1096_v20 }
  0xcd   :  { %1016 = vmatprep.subr.mxu0 %v1940_v7  ;;  %1639 = vmatprep.subr.mxu1 %v1111_v21 }
  0xce   :  { %1017 = vmatpush1.msra.mxu0 %v895_v55  ;;  %1640 = vmatpush3.msra.mxu1 %v1095_v22 }
  0xcf   :  { %1018 = vmatprep.subr.mxu0 %v1940_v7  ;;  %1641 = vmatprep.subr.mxu1 %v1110_v23 }
  0xd0   :  { %1019 = vmatpush1.msra.mxu0 %v894_v56  ;;  %1642 = vmatpush3.msra.mxu1 %v1094_v24 }
  0xd1   :  { %1020 = vmatprep.subr.mxu0 %v1940_v7  ;;  %1643 = vmatprep.subr.mxu1 %v1109_v25 }
  0xd2   :  { %1021 = vmatpush1.msra.mxu0 %v893_v57  ;;  %1644 = vmatpush3.msra.mxu1 %v1093_v26 }
  0xd3   :  { %1022 = vmatprep.subr.mxu0 %v1940_v7  ;;  %1645 = vmatprep.subr.mxu1 %v1108_v27 }
  0xd4   :  { %1023 = vmatpush1.msra.mxu0 %v892_v58  ;;  %1646 = vmatpush3.msra.mxu1 %v1092_v28 }
  0xd5   :  { %1024 = vmatprep.subr.mxu0 %v1940_v7  ;;  %1647 = vmatprep.subr.mxu1 %v1107_v29 }
  0xd6   :  { %1025 = vmatpush1.msra.mxu0 %v891_v59  ;;  %1648 = vmatpush3.msra.mxu1 %v1091_v30 }
  0xd7   :  { %1026 = vmatprep.subr.mxu0 %v1940_v7  ;;  %1649 = vmatprep.subr.mxu1 %v1106_v31 }
  0xd8   :  { %1027 = vmatpush1.msra.mxu0 %v890_v60  ;;  %1650 = vmatpush3.msra.mxu1 %v1090_v32 }
  0xd9   :  { %1028 = vmatprep.subr.mxu0 %v1940_v7  ;;  %1651 = vmatprep.subr.mxu1 %v1105_v33 }
  0xda   :  { %1029 = vmatpush1.msra.mxu0 %v889_v61  ;;  %1652 = vmatpush3.msra.mxu1 %v1089_v35  ;;  %v1128_v35 = vld [vmem:[%s2513_s9 + $0x170] sm:$0xff] }
  0xdb   :  { %1030 = vmatprep.subr.mxu0 %v1940_v7  ;;  %1653 = vmatprep.subr.mxu1 %v1104_v36 }
  0xdc   :  { %1031 = vmatpush1.msra.mxu0 %v888_v62  ;;  %1654 = vmatpush3.msra.mxu1 %v1088_v38  ;;  %v1126_v38 = vld [vmem:[%s2513_s9 + $0x160] sm:$0xff] }
  0xdd   :  { %1032 = vmatprep.subr.mxu0 %v1940_v7  ;;  %1655 = vmatprep.subr.mxu1 %v1103_v40  ;;  %v1125_v40 = vld [vmem:[%s2513_s9 + $0x158] sm:$0xff] }
  0xde   :  { %1033 = vmatpush1.msra.mxu0 %v887_v63  ;;  %1656 = vmatpush3.msra.mxu1 %v1087_v41  ;;  %v1124_v41 = vld [vmem:[%s2513_s9 + $0x150] sm:$0xff] }
  0xdf   :  { %1036 = vmatprep.subr.mxu0 %v1940_v7  ;;  %1657 = vmatprep.subr.mxu1 %v1102_v42 }
  0xe0   :  { %1407 = vmatpush2.msk.msra.mxu0 %vm561_vm4, %v917_v0  ;;  %1658 = vmatpush3.msra.mxu1 %v1086_v43  ;;  %v1406_v43 = vld [vmem:[%s2512_s8] ss:$0 sm:$0xff] }
  0xe1   :  { %1038 = vmatprep.subr.mxu0 %v1940_v7  ;;  %1659 = vmatprep.subr.mxu1 %v1101_v44  ;;  %v1123_v44 = vld [vmem:[%s2513_s9 + $0x148] sm:$0xff] }
  0xe2   :  { %1039 = vmatpush2.msra.mxu0 %v916_v1  ;;  %1660 = vmatpush3.msra.mxu1 %v1085_v45  ;;  %v1122_v45 = vld [vmem:[%s2513_s9 + $0x140] sm:$0xff] }
  0xe3   :  { %1040 = vmatprep.subr.mxu0 %v1940_v7  ;;  %1661 = vmatprep.subr.mxu1 %v1100_v46 }
  0xe4   :  { %1041 = vmatpush2.msra.mxu0 %v915_v2  ;;  %1662 = vmatpush3.msra.mxu1 %v1084_v47 }
  0xe5   :  { %1042 = vmatprep.subr.mxu0 %v1940_v7  ;;  %1663 = vmatprep.subr.mxu1 %v1099_v48  ;;  %v1121_v48 = vld [vmem:[%s2513_s9 + $0x138] sm:$0xff] }
  0xe6   :  { %1043 = vmatpush2.msra.mxu0 %v914_v3  ;;  %1664 = vmatpush3.msra.mxu1 %v1083_v49 }
  0xe7   :  { %1044 = vmatprep.subr.mxu0 %v1940_v7  ;;  %1665 = vmatprep.subr.mxu1 %v1098_v50 }
  0xe8   :  { %1045 = vmatpush2.msra.mxu0 %v913_v4  ;;  %1666 = vmatpush3.msra.mxu1 %v1082_v51  ;;  %v1403_v4 = vld [vmem:[%s2510_s6] ss:$0 sm:$0xff]  ;;  %v1120_v51 = vld [vmem:[%s2513_s9 + $0x130] sm:$0xff] }
  0xe9   :  { %1046 = vmatprep.subr.mxu0 %v1940_v7  ;;  %1723 = vmatprep.subr.mxu1 %v1940_v7 }
  0xea   :  { %1047 = vmatpush2.msra.mxu0 %v912_v5 }
  0xeb   :  { %1048 = vmatprep.subr.mxu0 %v1940_v7 }
  0xec   :  { %1049 = vmatpush2.msra.mxu0 %v911_v6 }
  0xed   :  { %1050 = vmatprep.subr.mxu0 %v1940_v7 }
  0xee   :  { %1051 = vmatpush2.msra.mxu0 %v910_v8 }
  0xef   :  { %1052 = vmatprep.subr.mxu0 %v1940_v7 }
  0xf0   :  { %1053 = vmatpush2.msra.mxu0 %v909_v9 }
  0xf1   :  { %1054 = vmatprep.subr.mxu0 %v1940_v7 }
  0xf2   :  { %1055 = vmatpush2.msra.mxu0 %v908_v10 }
  0xf3   :  { %1056 = vmatprep.subr.mxu0 %v1940_v7 }
  0xf4   :  { %1057 = vmatpush2.msra.mxu0 %v907_v11 }
  0xf5   :  { %1058 = vmatprep.subr.mxu0 %v1940_v7 }
  0xf6   :  { %1059 = vmatpush2.msra.mxu0 %v906_v12 }
  0xf7   :  { %1060 = vmatprep.subr.mxu0 %v1940_v7 }
  0xf8   :  { %1061 = vmatpush2.msra.mxu0 %v905_v13 }
  0xf9   :  { %1062 = vmatprep.subr.mxu0 %v1940_v7 }
  0xfa   :  { %1063 = vmatpush2.msra.mxu0 %v904_v14 }
  0xfb   :  { %1064 = vmatprep.subr.mxu0 %v1940_v7 }
  0xfc   :  { %1065 = vmatpush2.msra.mxu0 %v903_v15 }
  0xfd   :  { %1067 = vmatmul.mubr.f32.vlgmr.msra.gmra.mxu0 %v124_v16  ;;  %1758 = vmatprep.subr.mxu0 %v1940_v7 }
  0xfe   :  { %1774 = vmatprep.mubr.msk.f32.mxu0 %vm1941_vm2, %v1940_v7 }
 0x11f   :  { %v1444_v34 = vpop.f32.mrf.mxu0 }
 0x121   :  { %v1445_v37 = vpop.f32.mrf.mxu0  ;;  %v1479_v52 = vpop.f32.mrf.mxu1 }
 0x122   :  { %v1446_v39 = vadd.f32 %v1445_v37, %v1444_v34  ;;  %v1129_v34 = vld [vmem:[%s2513_s9 + $0x178] sm:$0xff]  ;;  %v1127_v37 = vld [vmem:[%s2513_s9 + $0x168] sm:$0xff] }
 0x123   :  { %v1480_v54 = vpop.f32.mrf.mxu1 }
 0x124   :  { %v284_v55 = vadd.f32 %v1446_v39, %v1400_v53  ;;  %v1481_v56 = vadd.f32 %v1480_v54, %v1479_v52  ;;  %v1119_v53 = vld [vmem:[%s2513_s9 + $0x128] sm:$0xff] }
 0x126   :  { %v354_v57 = vadd.f32 %v1481_v56, %v284_v55  ;;  %v1118_v55 = vld [vmem:[%s2513_s9 + $0x120] sm:$0xff]  ;;  %v1117_v56 = vld [vmem:[%s2513_s9 + $0x118] sm:$0xff] }
 0x139   :  { %v423_v58 = vpop.f32.mrf.mxu0 }
 0x13a   :  { %v424_v59 = vadd.f32 %v423_v58, %v354_v57  ;;  %v1116_v57 = vld [vmem:[%s2513_s9 + $0x110] sm:$0xff]  ;;  %v1115_v58 = vld [vmem:[%s2513_s9 + $0x108] sm:$0xff] }
 0x13b   :  { %v1722_v60 = vpop.f32.mrf.mxu0 }
 0x13c   :  { %v427_v62 = vmin.f32 %v424_v59, 20.0 }
 0x13e   :  { %v428_v3 = vmul.f32 1.442695, %v427_v62 }
 0x140   :  { %1787 = vpow2.f32 %v428_v3 }
 0x143   :  { %v1527_v61 = vpop.f32.mrf.mxu1 }
 0x145   :  { %v1528_v63 = vpop.f32.mrf.mxu1 }
 0x146   :  { %v1529_v2 = vadd.f32 %v1528_v63, %v1527_v61 }
 0x148   :  { %v632_v8 = vadd.f32 %v1529_v2, %v1403_v4  ;;  %v1294_v4 = vld [vmem:[#allocation10 + $0x38] sm:$0xff] }
 0x149   :  { %1759 = vmatpush3.msra.mxu0 %v1294_v4 }
 0x14a   :  { %1760 = vmatprep.subr.mxu0 %v1940_v7 }
 0x14d   :  { %v1788_v18 = vpop.eup %1787 }
 0x14e   :  { %v430_v19 = vadd.f32 1.0, %v1788_v18 }
 0x150   :  { %v431_v20 = vmul.f32 %v430_v19, %v430_v19 }
 0x152   :  { %v432_v21 = vadd.f32 1.0, %v431_v20 }
 0x15b   :  { %v1562_v0 = vpop.f32.mrf.mxu0 }
 0x15d   :  { %v1563_v5 = vpop.f32.mrf.mxu0 }
 0x15e   :  { %v1564_v9 = vadd.f32 %v1563_v5, %v1562_v0  ;;  %v1293_v5 = vld [vmem:[#allocation10 + $0x30] sm:$0xff] }
 0x15f   :  { %1761 = vmatpush3.msra.mxu0 %v1293_v5 }
 0x160   :  { %v702_v11 = vadd.f32 %v1564_v9, %v632_v8  ;;  %1762 = vmatprep.subr.mxu0 %v1940_v7  ;;  %v1291_v8 = vld [vmem:[#allocation10 + $0x20] sm:$0xff]  ;;  %v1290_v9 = vld [vmem:[#allocation10 + $0x18] sm:$0xff] }
 0x164   :  { %v1597_v1 = vpop.f32.mrf.mxu1 }
 0x166   :  { %v1598_v6 = vpop.f32.mrf.mxu1 }
 0x167   :  { %v1599_v10 = vadd.f32 %v1598_v6, %v1597_v1  ;;  %v1292_v6 = vld [vmem:[#allocation10 + $0x28] sm:$0xff] }
 0x168   :  { %1763 = vmatpush3.msra.mxu0 %v1292_v6 }
 0x169   :  { %v772_v12 = vadd.f32 %v1599_v10, %v702_v11  ;;  %1764 = vmatprep.subr.mxu0 %v1940_v7  ;;  %v1289_v10 = vld [vmem:[#allocation10 + $0x10] sm:$0xff]  ;;  %v1288_v11 = vld [vmem:[#allocation10 + $0x8] sm:$0xff] }
 0x16a   :  { %1765 = vmatpush3.msra.mxu0 %v1291_v8 }
 0x16b   :  { %1766 = vmatprep.subr.mxu0 %v1940_v7 }
 0x16c   :  { %1767 = vmatpush3.msra.mxu0 %v1290_v9 }
 0x16d   :  { %1768 = vmatprep.subr.mxu0 %v1940_v7 }
 0x16e   :  { %1769 = vmatpush3.msra.mxu0 %v1289_v10 }
 0x16f   :  { %1770 = vmatprep.subr.mxu0 %v1940_v7 }
 0x170   :  { %1771 = vmatpush3.msra.mxu0 %v1288_v11 }
 0x171   :  { %1772 = vmatprep.subr.mxu0 %v1940_v7 }
 0x17e   :  { %v841_v13 = vpop.f32.mrf.mxu0 }
 0x17f   :  { %v842_v14 = vadd.f32 %v841_v13, %v772_v12  ;;  %v1287_v12 = vld [vmem:[#allocation10] sm:$0xff] }
 0x180   :  { %v843_v15 = vpop.f32.mrf.mxu0  ;;  %1773 = vmatpush3.msra.mxu0 %v1287_v12 }
 0x181   :  { %v845_v16 = vmin.f32 %v842_v14, 20.0 }
 0x183   :  { %v846_v17 = vmul.f32 1.442695, %v845_v16  ;;  %v1409_v16 = vld [vmem:[%s2514_s10] ss:$0 sm:$0xff] }
 0x185   :  { %1789 = vpow2.f32 %v846_v17 }
 0x186   :  { %1791 = vrcp.f32 %v432_v21 }
 0x187   :  { %v1632_v36 = vpop.f32.mrf.mxu1 }
 0x189   :  { %v1633_v39 = vpop.f32.mrf.mxu1 }
 0x18a   :  { %v1634_v42 = vadd.f32 %v1633_v39, %v1632_v36 }
 0x18c   :  { %v999_v46 = vadd.f32 %v1634_v42, %v1406_v43 }
 0x192   :  { %v1790_v22 = vpop.eup %1789 }
 0x193   :  { %v848_v23 = vadd.f32 1.0, %v1790_v22  ;;  %v1792_v26 = vpop.eup %1791 }
 0x194   :  { %v434_v27 = vmul.f32 2.0, %v1792_v26 }
 0x195   :  { %v849_v24 = vmul.f32 %v848_v23, %v848_v23 }
 0x196   :  { %v435_v30 = vsub.f32 1.0, %v434_v27 }
 0x197   :  { %v850_v25 = vadd.f32 1.0, %v849_v24 }
 0x198   :  { %v436_v33 = vmul.f32 %v435_v30, %v424_v59  ;;  %v1114_v59 = vld [vmem:[%s2513_s9 + $0x100] sm:$0xff] }
 0x199   :  { %1793 = vrcp.f32 %v850_v25  ;;  %v1410_v30 = vld [vmem:[%s2516_s12] ss:$0 sm:$0xff] }
 0x1a6   :  { %v1794_v28 = vpop.eup %1793 }
 0x1a7   :  { %v852_v29 = vmul.f32 2.0, %v1794_v28 }
 0x1a9   :  { %v853_v31 = vsub.f32 1.0, %v852_v29 }
 0x1ab   :  { %v854_v32 = vmul.f32 %v853_v31, %v842_v14 }
 0x1ad   :  { %1201 = vmatprep.mubr.f32.mxu1 %v854_v32 }
 0x1ae   :  { %1202 = vmatmul.mubr.f32.vlgmr.msra.gmra.mxu1 %v436_v33 }
 0x1af   :  { %1724 = vmatpush3.msra.mxu1 %v1129_v34  ;;  %1755 = vmatprep.mubr.msk.f32.mxu1 %vm1941_vm2, %v1940_v7 }
 0x1b0   :  { %1725 = vmatprep.subr.mxu1 %v1940_v7 }
 0x1b1   :  { %1726 = vmatpush3.msra.mxu1 %v1128_v35 }
 0x1b2   :  { %1727 = vmatprep.subr.mxu1 %v1940_v7 }
 0x1b3   :  { %1728 = vmatpush3.msra.mxu1 %v1127_v37 }
 0x1b4   :  { %1729 = vmatprep.subr.mxu1 %v1940_v7 }
 0x1b5   :  { %1730 = vmatpush3.msra.mxu1 %v1126_v38 }
 0x1b6   :  { %1731 = vmatprep.subr.mxu1 %v1940_v7 }
 0x1b7   :  { %1732 = vmatpush3.msra.mxu1 %v1125_v40 }
 0x1b8   :  { %1733 = vmatprep.subr.mxu1 %v1940_v7 }
 0x1b9   :  { %1734 = vmatpush3.msra.mxu1 %v1124_v41 }
 0x1ba   :  { %1735 = vmatprep.subr.mxu1 %v1940_v7 }
 0x1bb   :  { %1736 = vmatpush3.msra.mxu1 %v1123_v44 }
 0x1bc   :  { %1737 = vmatprep.subr.mxu1 %v1940_v7 }
 0x1bd   :  { %v1068_v47 = vpop.f32.mrf.mxu0  ;;  %1738 = vmatpush3.msra.mxu1 %v1122_v45 }
 0x1be   :  { %v1069_v49 = vadd.f32 %v1068_v47, %v999_v46  ;;  %1739 = vmatprep.subr.mxu1 %v1940_v7 }
 0x1bf   :  { %v1070_v50 = vpop.f32.mrf.mxu0  ;;  %1740 = vmatpush3.msra.mxu1 %v1121_v48 }
 0x1c0   :  { %v1072_v52 = vmin.f32 %v1069_v49, 20.0  ;;  %1741 = vmatprep.subr.mxu1 %v1940_v7 }
 0x1c1   :  { %1742 = vmatpush3.msra.mxu1 %v1120_v51 }
 0x1c2   :  { %v1073_v54 = vmul.f32 1.442695, %v1072_v52  ;;  %1743 = vmatprep.subr.mxu1 %v1940_v7 }
 0x1c3   :  { %1744 = vmatpush3.msra.mxu1 %v1119_v53 }
 0x1c4   :  { %1795 = vpow2.f32 %v1073_v54  ;;  %1745 = vmatprep.subr.mxu1 %v1940_v7 }
 0x1c5   :  { %1746 = vmatpush3.msra.mxu1 %v1118_v55 }
 0x1c6   :  { %1747 = vmatprep.subr.mxu1 %v1940_v7 }
 0x1c7   :  { %1748 = vmatpush3.msra.mxu1 %v1117_v56 }
 0x1c8   :  { %1749 = vmatprep.subr.mxu1 %v1940_v7 }
 0x1c9   :  { %1750 = vmatpush3.msra.mxu1 %v1116_v57 }
 0x1ca   :  { %1751 = vmatprep.subr.mxu1 %v1940_v7 }
 0x1cb   :  { %1752 = vmatpush3.msra.mxu1 %v1115_v58 }
 0x1cc   :  { %1753 = vmatprep.subr.mxu1 %v1940_v7 }
 0x1cd   :  { %1754 = vmatpush3.msra.mxu1 %v1114_v59 }
 0x1d1   :  { %v1796_v60 = vpop.eup %1795 }
 0x1d2   :  { %v1075_v61 = vadd.f32 1.0, %v1796_v60 }
 0x1d4   :  { %v1076_v62 = vmul.f32 %v1075_v61, %v1075_v61 }
 0x1d6   :  { %v1077_v63 = vadd.f32 1.0, %v1076_v62 }
 0x1d8   :  { %1797 = vrcp.f32 %v1077_v63 }
 0x1e5   :  { %v1798_v0 = vpop.eup %1797 }
 0x1e6   :  { %v1079_v1 = vmul.f32 2.0, %v1798_v0 }
 0x1e8   :  { %v1080_v2 = vsub.f32 1.0, %v1079_v1 }
 0x1ea   :  { %v1081_v3 = vmul.f32 %v1080_v2, %v1069_v49 }
 0x1ec   :  { %1756 = vmatmul.mubr.f32.vlgmr.msra.gmra.mxu1 %v1081_v3 }
 0x26e   :  { %v1667_v13 = vpop.f32.mrf.mxu1 }
 0x270   :  { %v1668_v14 = vpop.f32.mrf.mxu1 }
 0x271   :  { %v1669_v15 = vadd.f32 %v1668_v14, %v1667_v13 }
 0x273   :  { %v1204_v17 = vadd.f32 %v1669_v15, %v1409_v16 }
 0x2ac   :  { %v1273_v18 = vpop.f32.mrf.mxu1 }
 0x2ad   :  { %v1274_v19 = vadd.f32 %v1273_v18, %v1204_v17 }
 0x2ae   :  { %v1757_v20 = vpop.f32.mrf.mxu1 }
 0x2af   :  { %v1277_v21 = vmin.f32 %v1274_v19, 20.0 }
 0x2b1   :  { %v1278_v22 = vmul.f32 1.442695, %v1277_v21 }
 0x2b3   :  { %1799 = vpow2.f32 %v1278_v22 }
 0x2c0   :  { %v1800_v23 = vpop.eup %1799 }
 0x2c1   :  { %v1280_v24 = vadd.f32 1.0, %v1800_v23 }
 0x2c3   :  { %v1281_v25 = vmul.f32 %v1280_v24, %v1280_v24 }
 0x2c5   :  { %v1282_v7 = vadd.f32 1.0, %v1281_v25 }
 0x2c7   :  { %1801 = vrcp.f32 %v1282_v7 }
 0x2d4   :  { %v1802_v26 = vpop.eup %1801 }
 0x2d5   :  { %v1284_v27 = vmul.f32 2.0, %v1802_v26 }
 0x2d7   :  { %v1285_v28 = vsub.f32 1.0, %v1284_v27 }
 0x2d9   :  { %v1286_v29 = vmul.f32 %v1285_v28, %v1274_v19 }
 0x2db   :  { %1775 = vmatmul.mubr.msk.f32.vlgmr.msra.gmra.mxu0 %vm1302_vm6, %v1286_v29 }
 0x39b   :  { %v1372_v31 = vpop.f32.mrf.mxu0 }
 0x39c   :  { %v1373_v32 = vadd.f32 %v1410_v30, %v1372_v31 }
 0x39d   :  { %v1776_v33 = vpop.f32.mrf.mxu0 }
 0x39e   :  { %v1376_v34 = vmul.f32 %v1373_v32, %v1373_v32 }
 0x3a0   :  { %1377 = vadd.xlane.f32.xlu0 %v1376_v34 }
 0x429   :  { %v1378_v35 = vpop.xlane.xlu0 %1377 }
 0x42a   :  { %v1379_v36 = vmax.f32 %v1378_v35, 1e-24 }
 0x42c   :  { %1803 = vrsqrt.f32 %v1379_v36 }
 0x439   :  { %v1804_v37 = vpop.eup %1803 }
 0x43a   :  { %v1381_v38 = vmul.f32 %v1804_v37, %v1373_v32 }
 0x43c   :  { %1382 = vst [vmem:[#allocation11] sm:$0xff] %v1381_v38 }
 0x43d   :  { %1916 = shalt.err (!%p1913_p1)
}
 0x43e   :  { %1392 = dma.vmem_to_hbm [thread:$0]  %s1390_s7, 128, %s2517_s13, [#allocation4]  }
 0x43f   :  { %1931 = dma.done.wait [#allocation4], 128  }
 0x440   :  { %1932 = vsyncadd [#allocation4], 4294967168 }
 0x441   :  { %1396 = vsyncpa [#allocation3], 1 }
 0x442   :  { %1397 = vsyncpa [#allocation6], 1 }
 0x443   :  { %1398 = vsyncpa [#allocation9], 1 }
 0x444   :  { %1399 = vsyncpa [#allocation4], 1 }

</bundles_post_ra>
